<compile_context>
chip_gen: v5e
topology: v5e:2x2
jax: 0.10.0
libtpu: 0.0.40
codegen_flags: <defaults>
</compile_context>

<pallas_src>
import math

import jax
import jax.numpy as jnp
from jax.experimental import pallas as pl
from jax.experimental.pallas import tpu as pltpu


def _round_up(n: int, m: int) -> int:
    return ((n + m - 1) // m) * m


def _choose_group(obs: int, hidden: int, act: int, *, lane: int = 128,
                  max_width: int = 2048) -> int:
    """Smallest group G with G*act a multiple of 128 (lane-dense output),
    capped so the block-diagonal weights stay small."""
    g = lane // math.gcd(lane, act)
    while g > 1 and g * max(obs, hidden, act) > max_width:
        g //= 2
    return max(g, 1)


def qnetwork_kernel(x_ref, w1_ref, w2_ref, w3_ref, b1_ref, b2_ref, b3_ref, o_ref):
    # x_ref : (rows, G*obs)        bf16  batch tile, G samples packed per row
    # w*_ref: block-diagonal weights, bf16 (resident across the grid)
    #         w1 (G*obs, G*hid), w2 (G*hid, G*hid), w3 (G*hid, G*act)
    # b*_ref: (1, G*hid)/(1, G*hid)/(1, G*act) f32 tiled biases (resident)
    # o_ref : (rows, G*act)        f32   lane-dense Q-value slab
    x = x_ref[...]

    # Layer 1: x @ W1 + b1, ReLU   (MXU bf16 in, f32 acc; VPU add/ReLU in f32)
    h1 = jnp.dot(x, w1_ref[...], preferred_element_type=jnp.float32)
    h1 = jnp.maximum(h1 + b1_ref[...], 0.0)

    # Layer 2: h1 @ W2 + b2, ReLU
    h2 = jnp.dot(h1.astype(jnp.bfloat16), w2_ref[...],
                 preferred_element_type=jnp.float32)
    h2 = jnp.maximum(h2 + b2_ref[...], 0.0)

    # Output layer: h2 @ W3 + b3  (no activation -- raw Q-values)
    q = jnp.dot(h2.astype(jnp.bfloat16), w3_ref[...],
                preferred_element_type=jnp.float32)
    o_ref[...] = (q + b3_ref[...]).astype(o_ref.dtype)


def qnetwork_forward(x, packed, *, block_batch: int = 4096):
    """x: (B, obs_dims) float32.  packed: output of pack_params().

    On v7x, pass block_batch ~= ceil(B/2) (it is rounded to 8*group) for large B
    so the 'parallel' batch axis shards across both TensorCores.
    """
    G = packed["group"]
    obs = packed["obs_dims"]
    act = packed["action_dims"]

    B = x.shape[0]
    row_quantum = 8 * G                               # keeps (8,128) tiling legal
    bt = _round_up(max(1, min(block_batch, B)), row_quantum)
    Bp = _round_up(B, bt)

    # Pad batch rows only (cheap, proportional to real data); no lane padding.
    xb = x.astype(jnp.bfloat16)
    if Bp != B:
        xb = jnp.zeros((Bp, obs), jnp.bfloat16).at[:B].set(xb)
    # Free row-major bitcast: pack G samples per lane-dense row.
    xg = xb.reshape(Bp // G, G * obs)

    rows = bt // G
    out = pl.pallas_call(
        qnetwork_kernel,
        out_shape=jax.ShapeDtypeStruct((Bp // G, G * act), jnp.float32),
        grid=(Bp // bt,),
        in_specs=[
            pl.BlockSpec((rows, G * obs), lambda i: (i, 0)),      # x: streams over batch
            pl.BlockSpec(packed["w1"].shape, lambda i: (0, 0)),   # weights: resident
            pl.BlockSpec(packed["w2"].shape, lambda i: (0, 0)),
            pl.BlockSpec(packed["w3"].shape, lambda i: (0, 0)),
            pl.BlockSpec(packed["b1"].shape, lambda i: (0, 0)),   # biases:  resident
            pl.BlockSpec(packed["b2"].shape, lambda i: (0, 0)),
            pl.BlockSpec(packed["b3"].shape, lambda i: (0, 0)),
        ],
        out_specs=pl.BlockSpec((rows, G * act), lambda i: (i, 0)),
        compiler_params=pltpu.CompilerParams(
            dimension_semantics=("parallel",),
        ),
    )(xg, packed["w1"], packed["w2"], packed["w3"],
      packed["b1"], packed["b2"], packed["b3"])

    # Free reshape (row-major bitcast) undoes the grouping; slice off batch padding.
    return out.reshape(Bp, act)[:B]


def init_params(key, obs_dims, hidden, actions):
    """nn.Linear-style init: uniform(-1/sqrt(fan_in), 1/sqrt(fan_in)); W stored (in, out)."""
    ks = jax.random.split(key, 6)

    def linear(kw, kb, fan_in, fan_out):
        bound = 1.0 / jnp.sqrt(fan_in)
        w = jax.random.uniform(kw, (fan_in, fan_out), jnp.float32, -bound, bound)
        b = jax.random.uniform(kb, (fan_out,), jnp.float32, -bound, bound)
        return w, b

    w1, b1 = linear(ks[0], ks[1], obs_dims, hidden)
    w2, b2 = linear(ks[2], ks[3], hidden, hidden)
    w3, b3 = linear(ks[4], ks[5], hidden, actions)
    return {"w1": w1, "b1": b1, "w2": w2, "b2": b2, "w3": w3, "b3": b3}


def pack_params(params):
    """Expand the three Linear layers into block-diagonal (G*in, G*out) bf16 weights
    and G-tiled f32 biases so G samples can be processed in one lane-dense row."""
    w1, b1 = params["w1"], params["b1"]
    w2, b2 = params["w2"], params["b2"]
    w3, b3 = params["w3"], params["b3"]
    obs, hid = w1.shape
    act = w3.shape[1]
    G = _choose_group(obs, hid, act)

    eye = jnp.eye(G, dtype=jnp.float32)

    def block_diag(w):
        # kron(I_G, w)[g*in + i, g'*out + o] = w[i, o] if g == g' else 0  (exact)
        return jnp.kron(eye, w).astype(jnp.bfloat16)

    def tile_bias(b):
        return jnp.tile(b.reshape(-1), G).reshape(1, -1).astype(jnp.float32)

    return {
        "w1": block_diag(w1), "w2": block_diag(w2), "w3": block_diag(w3),
        "b1": tile_bias(b1), "b2": tile_bias(b2), "b3": tile_bias(b3),
        "group": G, "obs_dims": obs, "hidden_dims": hid, "action_dims": act,
    }


if __name__ == "__main__":
    obs_space_dims = 16
    hidden_size = 32
    action_space_dims = 8
    batch = 256  # typical DQN replay batch; runs in a single grid step

    key = jax.random.PRNGKey(0)
    kx, kp = jax.random.split(key)
    x = jax.random.normal(kx, (batch, obs_space_dims), jnp.float32)
    params = init_params(kp, obs_space_dims, hidden_size, action_space_dims)
    packed = pack_params(params)

    q = qnetwork_forward(x, packed)
    q = jax.block_until_ready(q)
    assert q.shape == (batch, action_space_dims)

    # Reference 1: exact f32 PyTorch-equivalent math (loose tol: kernel feeds MXU bf16).
    h1 = jnp.maximum(x @ params["w1"] + params["b1"], 0.0)
    h2 = jnp.maximum(h1 @ params["w2"] + params["b2"], 0.0)
    q_f32 = h2 @ params["w3"] + params["b3"]
    assert jnp.allclose(q, q_f32, atol=5e-2, rtol=5e-2), float(jnp.max(jnp.abs(q - q_f32)))

    # Reference 2: same bf16-input / f32-accumulate path in plain JAX (tight tol).
    xb = x.astype(jnp.bfloat16)
    w1b = params["w1"].astype(jnp.bfloat16)
    w2b = params["w2"].astype(jnp.bfloat16)
    w3b = params["w3"].astype(jnp.bfloat16)
    r1 = jnp.maximum(jnp.dot(xb, w1b, preferred_element_type=jnp.float32) + params["b1"], 0.0)
    r2 = jnp.maximum(
        jnp.dot(r1.astype(jnp.bfloat16), w2b, preferred_element_type=jnp.float32) + params["b2"], 0.0
    )
    q_bf = jnp.dot(r2.astype(jnp.bfloat16), w3b, preferred_element_type=jnp.float32) + params["b3"]
    assert jnp.allclose(q, q_bf, atol=5e-3, rtol=5e-3), float(jnp.max(jnp.abs(q - q_bf)))

    # Ragged batch (not a multiple of the row quantum) exercises batch padding + slicing.
    x_small = x[:50]
    q_small = jax.block_until_ready(qnetwork_forward(x_small, packed))
    assert q_small.shape == (50, action_space_dims)
    assert jnp.allclose(q_small, q_f32[:50], atol=5e-2, rtol=5e-2)

    print("KERNEL_OK")
</pallas_src>

<mosaic_0001>
module attributes {stable_mosaic.version = 11 : i64} {
  func.func @qnetwork_kernel(%arg0: i32, %arg1: memref<16x256xbf16, #tpu.memory_space<vmem>>, %arg2: memref<256x512xbf16, #tpu.memory_space<vmem>>, %arg3: memref<512x512xbf16, #tpu.memory_space<vmem>>, %arg4: memref<512x128xbf16, #tpu.memory_space<vmem>>, %arg5: memref<1x512xf32, #tpu.memory_space<vmem>>, %arg6: memref<1x512xf32, #tpu.memory_space<vmem>>, %arg7: memref<1x128xf32, #tpu.memory_space<vmem>>, %arg8: memref<16x128xf32, #tpu.memory_space<vmem>>) attributes {dimension_semantics = [#tpu.dimension_semantics<parallel>], iteration_bounds = array<i64: 1>, scalar_prefetch = 0 : i64, scratch_operands = 0 : i64, tpu.core_type = #tpu.core_type<tc>, window_params = [{transform_indices = @transform_0, window_bounds = array<i64: 16, 256>}, {pipeline_mode = #tpu.pipeline_mode<synchronous>, transform_indices = @transform_1, window_bounds = array<i64: 256, 512>}, {pipeline_mode = #tpu.pipeline_mode<synchronous>, transform_indices = @transform_2, window_bounds = array<i64: 512, 512>}, {pipeline_mode = #tpu.pipeline_mode<synchronous>, transform_indices = @transform_3, window_bounds = array<i64: 512, 128>}, {pipeline_mode = #tpu.pipeline_mode<synchronous>, transform_indices = @transform_4, window_bounds = array<i64: 1, 512>}, {pipeline_mode = #tpu.pipeline_mode<synchronous>, transform_indices = @transform_5, window_bounds = array<i64: 1, 512>}, {pipeline_mode = #tpu.pipeline_mode<synchronous>, transform_indices = @transform_6, window_bounds = array<i64: 1, 128>}, {transform_indices = @transform_7, window_bounds = array<i64: 16, 128>}]} {
    %c0 = arith.constant 0 : index
    %c0_0 = arith.constant 0 : index
    %0 = vector.load %arg1[%c0, %c0_0] : memref<16x256xbf16, #tpu.memory_space<vmem>>, vector<16x256xbf16>
    %c0_1 = arith.constant 0 : index
    %c0_2 = arith.constant 0 : index
    %1 = vector.load %arg2[%c0_1, %c0_2] : memref<256x512xbf16, #tpu.memory_space<vmem>>, vector<256x512xbf16>
    %cst = arith.constant dense<0.000000e+00> : vector<16x512xf32>
    %2 = tpu.matmul %0, %1, %cst {dimension_numbers = #tpu.dot_dimension_numbers<[1], [0], [0], [1], [0, 0, 1, 1], [], []>} : vector<16x256xbf16>, vector<256x512xbf16>, vector<16x512xf32> -> vector<16x512xf32>
    %c0_3 = arith.constant 0 : index
    %c0_4 = arith.constant 0 : index
    %3 = vector.load %arg5[%c0_3, %c0_4] : memref<1x512xf32, #tpu.memory_space<vmem>>, vector<1x512xf32>
    %4 = vector.broadcast %3 : vector<1x512xf32> to vector<16x512xf32>
    %5 = arith.addf %2, %4 : vector<16x512xf32>
    %cst_5 = arith.constant 0.000000e+00 : f32
    %6 = vector.broadcast %cst_5 : f32 to vector<16x512xf32>
    %7 = arith.maximumf %5, %6 : vector<16x512xf32>
    %8 = arith.truncf %7 : vector<16x512xf32> to vector<16x512xbf16>
    %c0_6 = arith.constant 0 : index
    %c0_7 = arith.constant 0 : index
    %9 = vector.load %arg3[%c0_6, %c0_7] : memref<512x512xbf16, #tpu.memory_space<vmem>>, vector<512x512xbf16>
    %cst_8 = arith.constant dense<0.000000e+00> : vector<16x512xf32>
    %10 = tpu.matmul %8, %9, %cst_8 {dimension_numbers = #tpu.dot_dimension_numbers<[1], [0], [0], [1], [0, 0, 1, 1], [], []>} : vector<16x512xbf16>, vector<512x512xbf16>, vector<16x512xf32> -> vector<16x512xf32>
    %c0_9 = arith.constant 0 : index
    %c0_10 = arith.constant 0 : index
    %11 = vector.load %arg6[%c0_9, %c0_10] : memref<1x512xf32, #tpu.memory_space<vmem>>, vector<1x512xf32>
    %12 = vector.broadcast %11 : vector<1x512xf32> to vector<16x512xf32>
    %13 = arith.addf %10, %12 : vector<16x512xf32>
    %cst_11 = arith.constant 0.000000e+00 : f32
    %14 = vector.broadcast %cst_11 : f32 to vector<16x512xf32>
    %15 = arith.maximumf %13, %14 : vector<16x512xf32>
    %16 = arith.truncf %15 : vector<16x512xf32> to vector<16x512xbf16>
    %c0_12 = arith.constant 0 : index
    %c0_13 = arith.constant 0 : index
    %17 = vector.load %arg4[%c0_12, %c0_13] : memref<512x128xbf16, #tpu.memory_space<vmem>>, vector<512x128xbf16>
    %cst_14 = arith.constant dense<0.000000e+00> : vector<16x128xf32>
    %18 = tpu.matmul %16, %17, %cst_14 {dimension_numbers = #tpu.dot_dimension_numbers<[1], [0], [0], [1], [0, 0, 1, 1], [], []>} : vector<16x512xbf16>, vector<512x128xbf16>, vector<16x128xf32> -> vector<16x128xf32>
    %c0_15 = arith.constant 0 : index
    %c0_16 = arith.constant 0 : index
    %19 = vector.load %arg7[%c0_15, %c0_16] : memref<1x128xf32, #tpu.memory_space<vmem>>, vector<1x128xf32>
    %20 = vector.broadcast %19 : vector<1x128xf32> to vector<16x128xf32>
    %21 = arith.addf %18, %20 : vector<16x128xf32>
    %c0_17 = arith.constant 0 : index
    %c0_18 = arith.constant 0 : index
    %22 = vector.load %arg8[%c0_17, %c0_18] : memref<16x128xf32, #tpu.memory_space<vmem>>, vector<16x128xf32>
    tpu.vector_store %arg8[%c0_17, %c0_18], %21 {strides = array<i32>} : memref<16x128xf32, #tpu.memory_space<vmem>>, vector<16x128xf32>,
    return
  }
  func.func @transform_0(%arg0: i32) -> (i32, i32) {
    %c0_i32 = arith.constant 0 : i32
    %c0_i32_0 = arith.constant 0 : i32
    return %arg0, %c0_i32 : i32, i32
  }
  func.func @transform_1(%arg0: i32) -> (i32, i32) {
    %c0_i32 = arith.constant 0 : i32
    %c0_i32_0 = arith.constant 0 : i32
    %c0_i32_1 = arith.constant 0 : i32
    return %c0_i32, %c0_i32_0 : i32, i32
  }
  func.func @transform_2(%arg0: i32) -> (i32, i32) {
    %c0_i32 = arith.constant 0 : i32
    %c0_i32_0 = arith.constant 0 : i32
    %c0_i32_1 = arith.constant 0 : i32
    return %c0_i32, %c0_i32_0 : i32, i32
  }
  func.func @transform_3(%arg0: i32) -> (i32, i32) {
    %c0_i32 = arith.constant 0 : i32
    %c0_i32_0 = arith.constant 0 : i32
    %c0_i32_1 = arith.constant 0 : i32
    return %c0_i32, %c0_i32_0 : i32, i32
  }
  func.func @transform_4(%arg0: i32) -> (i32, i32) {
    %c0_i32 = arith.constant 0 : i32
    %c0_i32_0 = arith.constant 0 : i32
    %c0_i32_1 = arith.constant 0 : i32
    return %c0_i32, %c0_i32_0 : i32, i32
  }
  func.func @transform_5(%arg0: i32) -> (i32, i32) {
    %c0_i32 = arith.constant 0 : i32
    %c0_i32_0 = arith.constant 0 : i32
    %c0_i32_1 = arith.constant 0 : i32
    return %c0_i32, %c0_i32_0 : i32, i32
  }
  func.func @transform_6(%arg0: i32) -> (i32, i32) {
    %c0_i32 = arith.constant 0 : i32
    %c0_i32_0 = arith.constant 0 : i32
    %c0_i32_1 = arith.constant 0 : i32
    return %c0_i32, %c0_i32_0 : i32, i32
  }
  func.func @transform_7(%arg0: i32) -> (i32, i32) {
    %c0_i32 = arith.constant 0 : i32
    %c0_i32_0 = arith.constant 0 : i32
    return %arg0, %c0_i32 : i32, i32
  }
}

</mosaic_0001>

<bundles_post_ra>
// kernel: tpu_custom_call.1
= control target key start
LH: loop header
LB: loop body
LE: loop exit
PB: predicated region body
PF: predicated region fallthrough
CT: control target
= control target key end

     0   :  { %12 = vsyncpa [#allocation3], 0  ;;  %s3411_s0 = inlined_call_operand.hbm [shape: bf16[16,256], index: 0, kind: input, shape index: {}]   ;;  %s3412_s1 = inlined_call_operand.hbm [shape: bf16[256,512], index: 1, kind: input, shape index: {}]   ;;  %s3413_s2 = inlined_call_operand.hbm [shape: bf16[512,512], index: 2, kind: input, shape index: {}]   ;;  %s3414_s3 = inlined_call_operand.hbm [shape: bf16[512,128], index: 3, kind: input, shape index: {}]   ;;  %s3415_s4 = inlined_call_operand.hbm [shape: f32[1,512], index: 4, kind: input, shape index: {}]   ;;  %s3416_s5 = inlined_call_operand.vmem [shape: f32[1,512], index: 5, kind: input, shape index: {}]   ;;  %s3417_s6 = inlined_call_operand.vmem [shape: f32[1,128], index: 6, kind: input, shape index: {}]   ;;  %s3418_s7 = inlined_call_operand.hbm [shape: f32[16,128], index: 7, kind: output, shape index: {}]  }
   0x1   :  { %13 = vsyncpa [#allocation6], 0 }
   0x2   :  { %14 = vsyncpa [#allocation9], 0  ;;  %s33_s26 = sshll.u32 %s3412_s1, 4  ;;  %s34_s26 = int_to_ptr.hbm [resolvable:$true] %s33_s26 }
   0x3   :  { %15 = vsyncpa [#allocation4], 0  ;;  %s3281_s27 = smov [#allocation5]   ;;  %s59_s8 = sshll.u32 %s3414_s3, 4  ;;  %s60_s8 = int_to_ptr.hbm [resolvable:$true] %s59_s8 }
   0x4   :  { %s35_s28 = sshll.u32 %s3281_s27, 4  ;;  %s3282_s9 = smov 256   ;;  %s36_s28 = int_to_ptr.vmem [resolvable:$true] %s35_s28 }
   0x5   :  { %s3283_s10 = smov 16   ;;  %s3284_s11 = smov [#allocation8]  }
   0x6   :  { %41 = dma.hbm_to_vmem [thread:$0]  %s34_s26, 8192, %s36_s28, [#allocation6], %s3282_s9, %s3282_s9, %s3283_s10  }
   0x7   :  { %s61_s12 = sshll.u32 %s3284_s11, 4  ;;  %s3285_s13 = smov 64   ;;  %s62_s12 = int_to_ptr.vmem [resolvable:$true] %s61_s12 }
   0x8   :  { %s3286_s14 = smov 4   ;;  %s20_s16 = sshll.u32 %s3411_s0, 4  ;;  %s21_s16 = int_to_ptr.hbm [resolvable:$true] %s20_s16 }
   0x9   :  { %67 = dma.hbm_to_vmem [thread:$0]  %s60_s8, 4096, %s62_s12, [#allocation9], %s3285_s13, %s3285_s13, %s3286_s14  }
   0xa   :  { %s3287_s17 = smov [#allocation2]   ;;  %s46_s20 = sshll.u32 %s3413_s2, 4  ;;  %s47_s20 = int_to_ptr.hbm [resolvable:$true] %s46_s20 }
   0xb   :  { %s22_s18 = sshll.u32 %s3287_s17, 4  ;;  %s3288_s21 = smov 128   ;;  %s23_s18 = int_to_ptr.vmem [resolvable:$true] %s22_s18 }
   0xc   :  { %s3289_s22 = smov 8   ;;  %s3290_s23 = smov [#allocation7]  }
   0xd   :  { %28 = dma.hbm_to_vmem [thread:$0]  %s21_s16, 256, %s23_s18, [#allocation3], %s3288_s21, %s3288_s21, %s3289_s22  }
   0xe   :  { %s48_s24 = sshll.u32 %s3290_s23, 4  ;;  %s73_s0 = sshll.u32 %s3415_s4, 4  ;;  %s49_s24 = int_to_ptr.vmem [resolvable:$true] %s48_s24  ;;  %s74_s0 = int_to_ptr.hbm [resolvable:$true] %s73_s0 }
   0xf   :  { %54 = dma.hbm_to_vmem [thread:$0]  %s47_s20, 16384, %s49_s24, [#allocation6], %s3282_s9, %s3282_s9, %s3283_s10  }
  0x10   :  { %s3291_s27 = smov [#allocation10]  }
  0x11   :  { %s75_s28 = sshll.u32 %s3291_s27, 4  ;;  %s76_s28 = int_to_ptr.vmem [resolvable:$true] %s75_s28 }
  0x12   :  { %78 = dma.hbm_to_vmem [thread:$0]  %s74_s0, 64, %s76_s28, [#allocation9]  }
  0x13   :  { %3273 = dma.done.wait [#allocation3], 256  }
  0x14   :  { %3274 = vsyncadd [#allocation3], 4294967040 }
  0x15   :  { %3275 = dma.done.wait [#allocation6], 24576  }
  0x16   :  { %3276 = vsyncadd [#allocation6], 4294942720 }
  0x17   :  { %3277 = dma.done.wait [#allocation9], 4160  }
  0x18   :  { %3278 = vsyncadd [#allocation9], 4294963136  ;;  %v2108_v0 = vld [vmem:[#allocation5 + $0xe0] sm:$0xf]  ;;  %v2922_v1 = vld [vmem:[#allocation5 + $0xec] sm:$0xf0] }
  0x19   :  { %v2236_v2 = vld [vmem:[#allocation5 + $0x1e0] sm:$0xf]  ;;  %v2109_v3 = vor.u32 %v2922_v1, %v2108_v0  ;;  %v2954_v4 = vld [vmem:[#allocation5 + $0x1ec] sm:$0xf0]  ;;  %v2920_v5 = vld [vmem:[#allocation5 + $0xe4] sm:$0xf] }
  0x1a   :  { %v2110_v6 = vld [vmem:[#allocation5 + $0xf0] sm:$0xf0]  ;;  %v2237_v7 = vor.u32 %v2954_v4, %v2236_v2  ;;  %v2952_v9 = vld [vmem:[#allocation5 + $0x1e4] sm:$0xf]  ;;  %v2092_v11 = vld [vmem:[#allocation5 + $0xc0] sm:$0xf] }
  0x1b   :  { %v2113_v8 = vor.u32 %v2920_v5, %v2110_v6  ;;  %v2238_v10 = vld [vmem:[#allocation5 + $0x1f0] sm:$0xf0]  ;;  %509 = vmatpush.bf16.msra.mxu0 %v2109_v3  ;;  %v2918_v13 = vld [vmem:[#allocation5 + $0xcc] sm:$0xf0]  ;;  %v2220_v14 = vld [vmem:[#allocation5 + $0x1c0] sm:$0xf] }
  0x1c   :  { %v2241_v12 = vor.u32 %v2952_v9, %v2238_v10  ;;  %v2950_v15 = vld [vmem:[#allocation5 + $0x1cc] sm:$0xf0]  ;;  %523 = vmatpush.bf16.msra.mxu1 %v2237_v7  ;;  %v2093_v16 = vor.u32 %v2918_v13, %v2092_v11  ;;  %v2916_v18 = vld [vmem:[#allocation5 + $0xc4] sm:$0xf]  ;;  %v2094_v19 = vld [vmem:[#allocation5 + $0xd0] sm:$0xf0] }
  0x1d   :  { %537 = vmatpush.bf16.msra.mxu2 %v2113_v8  ;;  %v2221_v17 = vor.u32 %v2950_v15, %v2220_v14  ;;  %v2948_v20 = vld [vmem:[#allocation5 + $0x1c4] sm:$0xf]  ;;  %v2097_v21 = vor.u32 %v2916_v18, %v2094_v19  ;;  %v2222_v22 = vld [vmem:[#allocation5 + $0x1d0] sm:$0xf0]  ;;  %v2076_v23 = vld [vmem:[#allocation5 + $0xa0] sm:$0xf] }
  0x1e   :  { %551 = vmatpush.bf16.msra.mxu3 %v2241_v12  ;;  %v2914_v24 = vld [vmem:[#allocation5 + $0xac] sm:$0xf0]  ;;  %v2225_v25 = vor.u32 %v2948_v20, %v2222_v22  ;;  %v2204_v26 = vld [vmem:[#allocation5 + $0x1a0] sm:$0xf]  ;;  %v2912_v28 = vld [vmem:[#allocation5 + $0xa4] sm:$0xf] }
  0x1f   :  { %v2946_v27 = vld [vmem:[#allocation5 + $0x1ac] sm:$0xf0]  ;;  %510 = vmatpush.bf16.msra.mxu0 %v2093_v16  ;;  %v2077_v29 = vor.u32 %v2914_v24, %v2076_v23  ;;  %v2078_v30 = vld [vmem:[#allocation5 + $0xb0] sm:$0xf0]  ;;  %v2944_v31 = vld [vmem:[#allocation5 + $0x1a4] sm:$0xf] }
  0x20   :  { %v2206_v32 = vld [vmem:[#allocation5 + $0x1b0] sm:$0xf0]  ;;  %524 = vmatpush.bf16.msra.mxu1 %v2221_v17  ;;  %v2205_v33 = vor.u32 %v2946_v27, %v2204_v26  ;;  %v2081_v34 = vor.u32 %v2912_v28, %v2078_v30  ;;  %v2060_v35 = vld [vmem:[#allocation5 + $0x80] sm:$0xf]  ;;  %v2910_v36 = vld [vmem:[#allocation5 + $0x8c] sm:$0xf0] }
  0x21   :  { %538 = vmatpush.bf16.msra.mxu2 %v2097_v21  ;;  %v2188_v37 = vld [vmem:[#allocation5 + $0x180] sm:$0xf]  ;;  %v2209_v38 = vor.u32 %v2944_v31, %v2206_v32  ;;  %v2942_v39 = vld [vmem:[#allocation5 + $0x18c] sm:$0xf0]  ;;  %v2908_v40 = vld [vmem:[#allocation5 + $0x84] sm:$0xf]  ;;  %v2061_v44 = vor.u32 %v2910_v36, %v2060_v35 }
  0x22   :  { %552 = vmatpush.bf16.msra.mxu3 %v2225_v25  ;;  %v2062_v41 = vld [vmem:[#allocation5 + $0x90] sm:$0xf0]  ;;  %v2940_v42 = vld [vmem:[#allocation5 + $0x184] sm:$0xf]  ;;  %v2189_v45 = vor.u32 %v2942_v39, %v2188_v37  ;;  %v2044_v47 = vld [vmem:[#allocation5 + $0x60] sm:$0xf] }
  0x23   :  { %v2190_v43 = vld [vmem:[#allocation5 + $0x190] sm:$0xf0]  ;;  %511 = vmatpush.bf16.msra.mxu0 %v2077_v29  ;;  %v2065_v46 = vor.u32 %v2908_v40, %v2062_v41  ;;  %v2906_v48 = vld [vmem:[#allocation5 + $0x6c] sm:$0xf0]  ;;  %v2172_v49 = vld [vmem:[#allocation5 + $0x160] sm:$0xf] }
  0x24   :  { %525 = vmatpush.bf16.msra.mxu1 %v2205_v33  ;;  %v2193_v50 = vor.u32 %v2940_v42, %v2190_v43  ;;  %v2938_v51 = vld [vmem:[#allocation5 + $0x16c] sm:$0xf0]  ;;  %v2904_v52 = vld [vmem:[#allocation5 + $0x64] sm:$0xf]  ;;  %v2046_v53 = vld [vmem:[#allocation5 + $0x70] sm:$0xf0]  ;;  %v2045_v56 = vor.u32 %v2906_v48, %v2044_v47 }
  0x25   :  { %539 = vmatpush.bf16.msra.mxu2 %v2081_v34  ;;  %v2936_v54 = vld [vmem:[#allocation5 + $0x164] sm:$0xf]  ;;  %v2174_v55 = vld [vmem:[#allocation5 + $0x170] sm:$0xf0]  ;;  %v2173_v57 = vor.u32 %v2938_v51, %v2172_v49  ;;  %v2049_v58 = vor.u32 %v2904_v52, %v2046_v53  ;;  %v2028_v59 = vld [vmem:[#allocation5 + $0x40] sm:$0xf] }
  0x26   :  { %553 = vmatpush.bf16.msra.mxu3 %v2209_v38  ;;  %v2902_v60 = vld [vmem:[#allocation5 + $0x4c] sm:$0xf0]  ;;  %v2156_v61 = vld [vmem:[#allocation5 + $0x140] sm:$0xf]  ;;  %v2177_v62 = vor.u32 %v2936_v54, %v2174_v55  ;;  %v2900_v0 = vld [vmem:[#allocation5 + $0x44] sm:$0xf] }
  0x27   :  { %512 = vmatpush.bf16.msra.mxu0 %v2061_v44  ;;  %v2934_v63 = vld [vmem:[#allocation5 + $0x14c] sm:$0xf0]  ;;  %v2030_v1 = vld [vmem:[#allocation5 + $0x50] sm:$0xf0]  ;;  %v2932_v2 = vld [vmem:[#allocation5 + $0x144] sm:$0xf]  ;;  %v2029_v4 = vor.u32 %v2902_v60, %v2028_v59 }
  0x28   :  { %526 = vmatpush.bf16.msra.mxu1 %v2189_v45  ;;  %v2158_v3 = vld [vmem:[#allocation5 + $0x150] sm:$0xf0]  ;;  %v2157_v5 = vor.u32 %v2934_v63, %v2156_v61  ;;  %v2033_v6 = vor.u32 %v2900_v0, %v2030_v1  ;;  %v2012_v7 = vld [vmem:[#allocation5 + $0x20] sm:$0xf]  ;;  %v2898_v8 = vld [vmem:[#allocation5 + $0x2c] sm:$0xf0] }
  0x29   :  { %540 = vmatpush.bf16.msra.mxu2 %v2065_v46  ;;  %v2140_v9 = vld [vmem:[#allocation5 + $0x120] sm:$0xf]  ;;  %v2161_v10 = vor.u32 %v2932_v2, %v2158_v3  ;;  %v2930_v11 = vld [vmem:[#allocation5 + $0x12c] sm:$0xf0]  ;;  %v2896_v12 = vld [vmem:[#allocation5 + $0x24] sm:$0xf]  ;;  %v2013_v16 = vor.u32 %v2898_v8, %v2012_v7 }
  0x2a   :  { %554 = vmatpush.bf16.msra.mxu3 %v2193_v50  ;;  %v2014_v13 = vld [vmem:[#allocation5 + $0x30] sm:$0xf0]  ;;  %v2928_v14 = vld [vmem:[#allocation5 + $0x124] sm:$0xf]  ;;  %v1996_v17 = vld [vmem:[#allocation5] sm:$0xf]  ;;  %v2141_v20 = vor.u32 %v2930_v11, %v2140_v9 }
  0x2b   :  { %513 = vmatpush.bf16.msra.mxu0 %v2045_v56  ;;  %v2142_v15 = vld [vmem:[#allocation5 + $0x130] sm:$0xf0]  ;;  %v2894_v18 = vld [vmem:[#allocation5 + $0xc] sm:$0xf0]  ;;  %v2124_v19 = vld [vmem:[#allocation5 + $0x100] sm:$0xf]  ;;  %v2017_v21 = vor.u32 %v2896_v12, %v2014_v13 }
  0x2c   :  { %527 = vmatpush.bf16.msra.mxu1 %v2173_v57  ;;  %v2926_v22 = vld [vmem:[#allocation5 + $0x10c] sm:$0xf0]  ;;  %v2892_v23 = vld [vmem:[#allocation5 + $0x4] sm:$0xf]  ;;  %v1998_v24 = vld [vmem:[#allocation5 + $0x10] sm:$0xf0]  ;;  %v2145_v25 = vor.u32 %v2928_v14, %v2142_v15  ;;  %v1997_v32 = vor.u32 %v2894_v18, %v1996_v17 }
  0x2d   :  { %541 = vmatpush.bf16.msra.mxu2 %v2049_v58  ;;  %v2924_v26 = vld [vmem:[#allocation5 + $0x104] sm:$0xf]  ;;  %v2126_v27 = vld [vmem:[#allocation5 + $0x110] sm:$0xf0]  ;;  %v2116_v28 = vld [vmem:[#allocation5 + $0xe8] sm:$0xf]  ;;  %v2125_v36 = vor.u32 %v2926_v22, %v2124_v19  ;;  %v2001_v37 = vor.u32 %v2892_v23, %v1998_v24 }
  0x2e   :  { %555 = vmatpush.bf16.msra.mxu3 %v2177_v62  ;;  %v2923_v29 = vld [vmem:[#allocation5 + $0xf4] sm:$0xf0]  ;;  %v2244_v30 = vld [vmem:[#allocation5 + $0x1e8] sm:$0xf]  ;;  %v2921_v33 = vld [vmem:[#allocation5 + $0xec] sm:$0xf]  ;;  %v2129_v41 = vor.u32 %v2924_v26, %v2126_v27 }
  0x2f   :  { %514 = vmatpush.bf16.msra.mxu0 %v2029_v4  ;;  %v2955_v31 = vld [vmem:[#allocation5 + $0x1f4] sm:$0xf0]  ;;  %v2118_v34 = vld [vmem:[#allocation5 + $0xf8] sm:$0xf0]  ;;  %v2953_v35 = vld [vmem:[#allocation5 + $0x1ec] sm:$0xf]  ;;  %v2117_v42 = vor.u32 %v2923_v29, %v2116_v28 }
  0x30   :  { %528 = vmatpush.bf16.msra.mxu1 %v2157_v5  ;;  %v2246_v38 = vld [vmem:[#allocation5 + $0x1f8] sm:$0xf0]  ;;  %v1988_v39 = vld [vmem:[#allocation2] sm:$0xf]  ;;  %v2891_v40 = vld [vmem:[#allocation2 + $0x4] sm:$0xf0]  ;;  %v2245_v45 = vor.u32 %v2955_v31, %v2244_v30  ;;  %v2121_v46 = vor.u32 %v2921_v33, %v2118_v34 }
  0x31   :  { %542 = vmatpush.bf16.msra.mxu2 %v2033_v6  ;;  %v2890_v43 = vld [vmem:[#allocation2 + $0x4] sm:$0xf]  ;;  %v1990_v44 = vld [vmem:[#allocation2 + $0x8] sm:$0xf0]  ;;  %v2100_v47 = vld [vmem:[#allocation5 + $0xc8] sm:$0xf]  ;;  %v2249_v50 = vor.u32 %v2953_v35, %v2246_v38  ;;  %v3351_v51 = vor.u32 %v2891_v40, %v1988_v39 }
  0x32   :  { %556 = vmatpush.bf16.msra.mxu3 %v2161_v10  ;;  %v2919_v48 = vld [vmem:[#allocation5 + $0xd4] sm:$0xf0]  ;;  %v2228_v49 = vld [vmem:[#allocation5 + $0x1c8] sm:$0xf]  ;;  %v2917_v53 = vld [vmem:[#allocation5 + $0xcc] sm:$0xf]  ;;  %v3353_v55 = vor.u32 %v2890_v43, %v1990_v44 }
  0x33   :  { %515 = vmatpush.bf16.msra.mxu0 %v2013_v16  ;;  %v2951_v52 = vld [vmem:[#allocation5 + $0x1d4] sm:$0xf0]  ;;  %v2102_v54 = vld [vmem:[#allocation5 + $0xd8] sm:$0xf0]  ;;  %v2949_v56 = vld [vmem:[#allocation5 + $0x1cc] sm:$0xf]  ;;  %v2101_v58 = vor.u32 %v2919_v48, %v2100_v47 }
  0x34   :  { %529 = vmatpush.bf16.msra.mxu1 %v2141_v20  ;;  %v2230_v57 = vld [vmem:[#allocation5 + $0x1d8] sm:$0xf0]  ;;  %v2229_v59 = vor.u32 %v2951_v52, %v2228_v49  ;;  %v2105_v60 = vor.u32 %v2917_v53, %v2102_v54  ;;  %v2084_v61 = vld [vmem:[#allocation5 + $0xa8] sm:$0xf]  ;;  %v2915_v62 = vld [vmem:[#allocation5 + $0xb4] sm:$0xf0] }
  0x35   :  { %543 = vmatpush.bf16.msra.mxu2 %v2017_v21  ;;  %v2212_v63 = vld [vmem:[#allocation5 + $0x1a8] sm:$0xf]  ;;  %v2233_v0 = vor.u32 %v2949_v56, %v2230_v57  ;;  %v2947_v1 = vld [vmem:[#allocation5 + $0x1b4] sm:$0xf0]  ;;  %v2913_v2 = vld [vmem:[#allocation5 + $0xac] sm:$0xf]  ;;  %v2085_v6 = vor.u32 %v2915_v62, %v2084_v61 }
  0x36   :  { %557 = vmatpush.bf16.msra.mxu3 %v2145_v25  ;;  %v2086_v3 = vld [vmem:[#allocation5 + $0xb8] sm:$0xf0]  ;;  %v2945_v4 = vld [vmem:[#allocation5 + $0x1ac] sm:$0xf]  ;;  %v2213_v7 = vor.u32 %v2947_v1, %v2212_v63  ;;  %v2068_v9 = vld [vmem:[#allocation5 + $0x88] sm:$0xf] }
  0x37   :  { %516 = vmatpush.bf16.msra.mxu0 %v1997_v32  ;;  %v2214_v5 = vld [vmem:[#allocation5 + $0x1b8] sm:$0xf0]  ;;  %v2089_v8 = vor.u32 %v2913_v2, %v2086_v3  ;;  %v2911_v10 = vld [vmem:[#allocation5 + $0x94] sm:$0xf0]  ;;  %v2196_v11 = vld [vmem:[#allocation5 + $0x188] sm:$0xf] }
  0x38   :  { %530 = vmatpush.bf16.msra.mxu1 %v2125_v36  ;;  %v2217_v12 = vor.u32 %v2945_v4, %v2214_v5  ;;  %v2943_v13 = vld [vmem:[#allocation5 + $0x194] sm:$0xf0]  ;;  %v2909_v14 = vld [vmem:[#allocation5 + $0x8c] sm:$0xf]  ;;  %v2070_v15 = vld [vmem:[#allocation5 + $0x98] sm:$0xf0]  ;;  %v2069_v18 = vor.u32 %v2911_v10, %v2068_v9 }
  0x39   :  { %544 = vmatpush.bf16.msra.mxu2 %v2001_v37  ;;  %v2941_v16 = vld [vmem:[#allocation5 + $0x18c] sm:$0xf]  ;;  %v2198_v17 = vld [vmem:[#allocation5 + $0x198] sm:$0xf0]  ;;  %v2197_v19 = vor.u32 %v2943_v13, %v2196_v11  ;;  %v2073_v20 = vor.u32 %v2909_v14, %v2070_v15  ;;  %v2052_v21 = vld [vmem:[#allocation5 + $0x68] sm:$0xf] }
  0x3a   :  { %558 = vmatpush.bf16.msra.mxu3 %v2129_v41  ;;  %517 = vmatmul.bf16.vlgmr.msra.gmra.mxu0 %v3351_v51  ;;  %v2907_v22 = vld [vmem:[#allocation5 + $0x74] sm:$0xf0]  ;;  %v2180_v23 = vld [vmem:[#allocation5 + $0x168] sm:$0xf]  ;;  %v2201_v24 = vor.u32 %v2941_v16, %v2198_v17  ;;  %v2905_v26 = vld [vmem:[#allocation5 + $0x6c] sm:$0xf] }
  0x3b   :  { %565 = vmatpush.bf16.msrb.mxu0 %v2117_v42  ;;  %531 = vmatmul.bf16.vlgmr.msra.gmra.mxu1 %v3353_v55  ;;  %v2939_v25 = vld [vmem:[#allocation5 + $0x174] sm:$0xf0]  ;;  %v2054_v27 = vld [vmem:[#allocation5 + $0x78] sm:$0xf0]  ;;  %v2937_v28 = vld [vmem:[#allocation5 + $0x16c] sm:$0xf]  ;;  %v2053_v30 = vor.u32 %v2907_v22, %v2052_v21 }
  0x3c   :  { %579 = vmatpush.bf16.msrb.mxu1 %v2245_v45  ;;  %545 = vmatmul.bf16.vlgmr.msra.gmra.mxu2 %v3351_v51  ;;  %v2182_v29 = vld [vmem:[#allocation5 + $0x178] sm:$0xf0]  ;;  %v2181_v31 = vor.u32 %v2939_v25, %v2180_v23  ;;  %v2057_v32 = vor.u32 %v2905_v26, %v2054_v27  ;;  %v2036_v33 = vld [vmem:[#allocation5 + $0x48] sm:$0xf]  ;;  %v2903_v34 = vld [vmem:[#allocation5 + $0x54] sm:$0xf0] }
  0x3d   :  { %593 = vmatpush.bf16.msrb.mxu2 %v2121_v46  ;;  %559 = vmatmul.bf16.vlgmr.msra.gmra.mxu3 %v3353_v55  ;;  %v2164_v35 = vld [vmem:[#allocation5 + $0x148] sm:$0xf]  ;;  %v2185_v36 = vor.u32 %v2937_v28, %v2182_v29  ;;  %v2935_v37 = vld [vmem:[#allocation5 + $0x154] sm:$0xf0]  ;;  %v2901_v38 = vld [vmem:[#allocation5 + $0x4c] sm:$0xf]  ;;  %v2037_v42 = vor.u32 %v2903_v34, %v2036_v33 }
  0x3e   :  { %607 = vmatpush.bf16.msrb.mxu3 %v2249_v50  ;;  %v2038_v39 = vld [vmem:[#allocation5 + $0x58] sm:$0xf0]  ;;  %v2933_v40 = vld [vmem:[#allocation5 + $0x14c] sm:$0xf]  ;;  %v2020_v43 = vld [vmem:[#allocation5 + $0x28] sm:$0xf]  ;;  %v2165_v44 = vor.u32 %v2935_v37, %v2164_v35 }
  0x3f   :  { %566 = vmatpush.bf16.msrb.mxu0 %v2101_v58  ;;  %v2166_v41 = vld [vmem:[#allocation5 + $0x158] sm:$0xf0]  ;;  %v2041_v45 = vor.u32 %v2901_v38, %v2038_v39  ;;  %v2899_v46 = vld [vmem:[#allocation5 + $0x34] sm:$0xf0]  ;;  %v2148_v47 = vld [vmem:[#allocation5 + $0x128] sm:$0xf] }
  0x40   :  { %580 = vmatpush.bf16.msrb.mxu1 %v2229_v59  ;;  %v2169_v48 = vor.u32 %v2933_v40, %v2166_v41  ;;  %v2931_v49 = vld [vmem:[#allocation5 + $0x134] sm:$0xf0]  ;;  %v2897_v50 = vld [vmem:[#allocation5 + $0x2c] sm:$0xf]  ;;  %v2022_v52 = vld [vmem:[#allocation5 + $0x38] sm:$0xf0]  ;;  %v2021_v56 = vor.u32 %v2899_v46, %v2020_v43 }
  0x41   :  { %594 = vmatpush.bf16.msrb.mxu2 %v2105_v60  ;;  %v2929_v53 = vld [vmem:[#allocation5 + $0x12c] sm:$0xf]  ;;  %v2150_v54 = vld [vmem:[#allocation5 + $0x138] sm:$0xf0]  ;;  %v2004_v57 = vld [vmem:[#allocation5 + $0x8] sm:$0xf]  ;;  %v2149_v58 = vor.u32 %v2931_v49, %v2148_v47  ;;  %v2025_v59 = vor.u32 %v2897_v50, %v2022_v52 }
  0x42   :  { %608 = vmatpush.bf16.msrb.mxu3 %v2233_v0  ;;  %v2895_v60 = vld [vmem:[#allocation5 + $0x14] sm:$0xf0]  ;;  %v2132_v61 = vld [vmem:[#allocation5 + $0x108] sm:$0xf]  ;;  %v2153_v63 = vor.u32 %v2929_v53, %v2150_v54  ;;  %v2893_v0 = vld [vmem:[#allocation5 + $0xc] sm:$0xf] }
  0x43   :  { %567 = vmatpush.bf16.msrb.mxu0 %v2085_v6  ;;  %v2927_v62 = vld [vmem:[#allocation5 + $0x114] sm:$0xf0]  ;;  %v2006_v1 = vld [vmem:[#allocation5 + $0x18] sm:$0xf0]  ;;  %v2925_v2 = vld [vmem:[#allocation5 + $0x10c] sm:$0xf]  ;;  %v2005_v6 = vor.u32 %v2895_v60, %v2004_v57 }
  0x44   :  { %581 = vmatpush.bf16.msrb.mxu1 %v2213_v7  ;;  %v2134_v3 = vld [vmem:[#allocation5 + $0x118] sm:$0xf0]  ;;  %v2364_v4 = vld [vmem:[#allocation7 + $0xe0] sm:$0xf]  ;;  %v2986_v5 = vld [vmem:[#allocation7 + $0xec] sm:$0xf0]  ;;  %v2133_v9 = vor.u32 %v2927_v62, %v2132_v61  ;;  %v2009_v10 = vor.u32 %v2893_v0, %v2006_v1 }
  0x45   :  { %595 = vmatpush.bf16.msrb.mxu2 %v2089_v8  ;;  %v2492_v7 = vld [vmem:[#allocation7 + $0x1e0] sm:$0xf]  ;;  %v3018_v8 = vld [vmem:[#allocation7 + $0x1ec] sm:$0xf0]  ;;  %v2137_v11 = vor.u32 %v2925_v2, %v2134_v3  ;;  %v2984_v2 = vld [vmem:[#allocation7 + $0xe4] sm:$0xf] }
  0x46   :  { %609 = vmatpush.bf16.msrb.mxu3 %v2217_v12  ;;  %v2365_v12 = vor.u32 %v2986_v5, %v2364_v4  ;;  %v2620_v13 = vld [vmem:[#allocation7 + $0x2e0] sm:$0xf]  ;;  %v3050_v14 = vld [vmem:[#allocation7 + $0x2ec] sm:$0xf0]  ;;  %v2493_v17 = vor.u32 %v3018_v8, %v2492_v7  ;;  %v2366_v4 = vld [vmem:[#allocation7 + $0xf0] sm:$0xf0] }
  0x47   :  { %568 = vmatpush.bf16.msrb.mxu0 %v2069_v18  ;;  %v2348_v15 = vld [vmem:[#allocation7 + $0xc0] sm:$0xf]  ;;  %v2982_v16 = vld [vmem:[#allocation7 + $0xcc] sm:$0xf0]  ;;  %v3016_v7 = vld [vmem:[#allocation7 + $0x1e4] sm:$0xf] }
  0x48   :  { %582 = vmatpush.bf16.msrb.mxu1 %v2197_v19  ;;  %v2476_v18 = vld [vmem:[#allocation7 + $0x1c0] sm:$0xf]  ;;  %v3014_v19 = vld [vmem:[#allocation7 + $0x1cc] sm:$0xf0]  ;;  %v2349_v21 = vor.u32 %v2982_v16, %v2348_v15  ;;  %v2494_v8 = vld [vmem:[#allocation7 + $0x1f0] sm:$0xf0] }
  0x49   :  { %596 = vmatpush.bf16.msrb.mxu2 %v2073_v20  ;;  %v2621_v20 = vor.u32 %v3050_v14, %v2620_v13  ;;  %v2604_v22 = vld [vmem:[#allocation7 + $0x2c0] sm:$0xf]  ;;  %v3046_v23 = vld [vmem:[#allocation7 + $0x2cc] sm:$0xf0]  ;;  %v2477_v26 = vor.u32 %v3014_v19, %v2476_v18  ;;  %v2350_v13 = vld [vmem:[#allocation7 + $0xd0] sm:$0xf0]  ;;  %v2497_v14 = vor.u32 %v3016_v7, %v2494_v8 }
  0x4a   :  { %610 = vmatpush.bf16.msrb.mxu3 %v2201_v24  ;;  %v2332_v24 = vld [vmem:[#allocation7 + $0xa0] sm:$0xf]  ;;  %v2978_v25 = vld [vmem:[#allocation7 + $0xac] sm:$0xf0]  ;;  %v3012_v15 = vld [vmem:[#allocation7 + $0x1c4] sm:$0xf] }
  0x4b   :  { %569 = vmatpush.bf16.msrb.mxu0 %v2053_v30  ;;  %v2748_v27 = vld [vmem:[#allocation7 + $0x3e0] sm:$0xf]  ;;  %v3010_v29 = vld [vmem:[#allocation7 + $0x1ac] sm:$0xf0]  ;;  %v2333_v33 = vor.u32 %v2978_v25, %v2332_v24  ;;  %v2478_v16 = vld [vmem:[#allocation7 + $0x1d0] sm:$0xf0] }
  0x4c   :  { %583 = vmatpush.bf16.msrb.mxu1 %v2181_v31  ;;  %v2460_v28 = vld [vmem:[#allocation7 + $0x1a0] sm:$0xf]  ;;  %v3082_v30 = vld [vmem:[#allocation7 + $0x3ec] sm:$0xf0]  ;;  %v2605_v31 = vor.u32 %v3046_v23, %v2604_v22  ;;  %v2976_v18 = vld [vmem:[#allocation7 + $0xa4] sm:$0xf] }
  0x4d   :  { %597 = vmatpush.bf16.msrb.mxu2 %v2057_v32  ;;  %v2749_v32 = vor.u32 %v3082_v30, %v2748_v27  ;;  %v2316_v34 = vld [vmem:[#allocation7 + $0x80] sm:$0xf]  ;;  %v2974_v37 = vld [vmem:[#allocation7 + $0x8c] sm:$0xf0]  ;;  %v2461_v38 = vor.u32 %v3010_v29, %v2460_v28  ;;  %v2334_v19 = vld [vmem:[#allocation7 + $0xb0] sm:$0xf0] }
  0x4e   :  { %611 = vmatpush.bf16.msrb.mxu3 %v2185_v36  ;;  %v2588_v35 = vld [vmem:[#allocation7 + $0x2a0] sm:$0xf]  ;;  %v3042_v36 = vld [vmem:[#allocation7 + $0x2ac] sm:$0xf0]  ;;  %v2972_v24 = vld [vmem:[#allocation7 + $0x84] sm:$0xf] }
  0x4f   :  { %570 = vmatpush.bf16.msrb.mxu0 %v2037_v42  ;;  %v2732_v39 = vld [vmem:[#allocation7 + $0x3c0] sm:$0xf]  ;;  %v3078_v40 = vld [vmem:[#allocation7 + $0x3cc] sm:$0xf0]  ;;  %v2589_v43 = vor.u32 %v3042_v36, %v2588_v35  ;;  %v3008_v30 = vld [vmem:[#allocation7 + $0x1a4] sm:$0xf] }
  0x50   :  { %584 = vmatpush.bf16.msrb.mxu1 %v2165_v44  ;;  %v3006_v41 = vld [vmem:[#allocation7 + $0x18c] sm:$0xf0]  ;;  %v2733_v42 = vor.u32 %v3078_v40, %v2732_v39  ;;  %v2300_v44 = vld [vmem:[#allocation7 + $0x60] sm:$0xf]  ;;  %v2968_v36 = vld [vmem:[#allocation7 + $0x64] sm:$0xf] }
  0x51   :  { %598 = vmatpush.bf16.msrb.mxu2 %v2041_v45  ;;  %v2970_v45 = vld [vmem:[#allocation7 + $0x6c] sm:$0xf0]  ;;  %v2428_v47 = vld [vmem:[#allocation7 + $0x160] sm:$0xf]  ;;  %v2956_v8 = vld [vmem:[#allocation7 + $0x4] sm:$0xf] }
  0x52   :  { %612 = vmatpush.bf16.msrb.mxu3 %v2169_v48  ;;  %v3002_v48 = vld [vmem:[#allocation7 + $0x16c] sm:$0xf0]  ;;  %v2301_v49 = vor.u32 %v2970_v45, %v2300_v44  ;;  %v2284_v50 = vld [vmem:[#allocation7 + $0x40] sm:$0xf]  ;;  %s3292_s30 = smov [#allocation11]   ;;  %s1971_s11 = sshll.u32 %s3418_s7, 4  ;;  %s1972_s11 = int_to_ptr.hbm [resolvable:$true] %s1971_s11 }
  0x53   :  { %571 = vmatpush.bf16.msrb.mxu0 %v2021_v56  ;;  %v2966_v52 = vld [vmem:[#allocation7 + $0x4c] sm:$0xf0]  ;;  %v2429_v53 = vor.u32 %v3002_v48, %v2428_v47  ;;  %v2412_v54 = vld [vmem:[#allocation7 + $0x140] sm:$0xf]  ;;  %v2286_v48 = vld [vmem:[#allocation7 + $0x50] sm:$0xf0] }
  0x54   :  { %585 = vmatpush.bf16.msrb.mxu1 %v2149_v58  ;;  %v2998_v56 = vld [vmem:[#allocation7 + $0x14c] sm:$0xf0]  ;;  %v2285_v57 = vor.u32 %v2966_v52, %v2284_v50  ;;  %v2268_v58 = vld [vmem:[#allocation7 + $0x20] sm:$0xf]  ;;  %s1969_s8 = sshll.u32 %s3292_s30, 4  ;;  %s1970_s8 = int_to_ptr.vmem [resolvable:$true] %s1969_s8 }
  0x55   :  { %599 = vmatpush.bf16.msrb.mxu2 %v2025_v59  ;;  %v2962_v59 = vld [vmem:[#allocation7 + $0x2c] sm:$0xf0]  ;;  %v2413_v60 = vor.u32 %v2998_v56, %v2412_v54  ;;  %v2396_v61 = vld [vmem:[#allocation7 + $0x120] sm:$0xf]  ;;  %v2430_v56 = vld [vmem:[#allocation7 + $0x170] sm:$0xf0] }
  0x56   :  { %613 = vmatpush.bf16.msrb.mxu3 %v2153_v63  ;;  %v2994_v62 = vld [vmem:[#allocation7 + $0x12c] sm:$0xf0]  ;;  %v2269_v63 = vor.u32 %v2962_v59, %v2268_v58  ;;  %v2252_v0 = vld [vmem:[#allocation7] sm:$0xf] }
  0x57   :  { %572 = vmatpush.bf16.msrb.mxu0 %v2005_v6  ;;  %v2958_v1 = vld [vmem:[#allocation7 + $0xc] sm:$0xf0]  ;;  %v2397_v3 = vor.u32 %v2994_v62, %v2396_v61  ;;  %v2380_v5 = vld [vmem:[#allocation7 + $0x100] sm:$0xf]  ;;  %v2270_v62 = vld [vmem:[#allocation7 + $0x30] sm:$0xf0] }
  0x58   :  { %586 = vmatpush.bf16.msrb.mxu1 %v2133_v9  ;;  %v2990_v6 = vld [vmem:[#allocation7 + $0x10c] sm:$0xf0]  ;;  %v2253_v9 = vor.u32 %v2958_v1, %v2252_v0  ;;  %v2572_v22 = vld [vmem:[#allocation7 + $0x280] sm:$0xf] }
  0x59   :  { %600 = vmatpush.bf16.msrb.mxu2 %v2009_v10  ;;  %v2369_v10 = vor.u32 %v2984_v2, %v2366_v4  ;;  %v3038_v23 = vld [vmem:[#allocation7 + $0x28c] sm:$0xf0]  ;;  %v2716_v28 = vld [vmem:[#allocation7 + $0x3a0] sm:$0xf]  ;;  %v2996_v2 = vld [vmem:[#allocation7 + $0x144] sm:$0xf] }
  0x5a   :  { %614 = vmatpush.bf16.msrb.mxu3 %v2137_v11  ;;  %573 = vmatmul.bf16.vlgmr.msrb.gmra.mxu0 %v3351_v51  ;;  %v2381_v11 = vor.u32 %v2990_v6, %v2380_v5  ;;  %v2573_v25 = vor.u32 %v3038_v23, %v2572_v22  ;;  %v3074_v29 = vld [vmem:[#allocation7 + $0x3ac] sm:$0xf0]  ;;  %v2700_v40 = vld [vmem:[#allocation7 + $0x380] sm:$0xf]  ;;  %v2414_v4 = vld [vmem:[#allocation7 + $0x150] sm:$0xf0] }
  0x5b   :  { %1411 = vmatpush.bf16.msra.mxu0 %v2365_v12  ;;  %587 = vmatmul.bf16.vlgmr.msrb.gmra.mxu1 %v3353_v55  ;;  %v2980_v12 = vld [vmem:[#allocation7 + $0xc4] sm:$0xf]  ;;  %v3034_v35 = vld [vmem:[#allocation7 + $0x26c] sm:$0xf0]  ;;  %v2540_v44 = vld [vmem:[#allocation7 + $0x240] sm:$0xf]  ;;  %v2417_v5 = vor.u32 %v2996_v2, %v2414_v4 }
  0x5c   :  { %1425 = vmatpush.bf16.msra.mxu1 %v2493_v17  ;;  %601 = vmatmul.bf16.vlgmr.msrb.gmra.mxu2 %v3351_v51  ;;  %v2444_v51 = vld [vmem:[#allocation7 + $0x180] sm:$0xf]  ;;  %v2353_v17 = vor.u32 %v2980_v12, %v2350_v13  ;;  %v3030_v45 = vld [vmem:[#allocation7 + $0x24c] sm:$0xf0]  ;;  %v2622_v12 = vld [vmem:[#allocation7 + $0x2f0] sm:$0xf0] }
  0x5d   :  { %615 = vmatmul.bf16.vlgmr.msrb.gmra.mxu3 %v3353_v55  ;;  %1439 = vmatpush.bf16.msra.mxu2 %v2621_v20  ;;  %v2317_v55 = vor.u32 %v2974_v37, %v2316_v34  ;;  %v2445_v46 = vor.u32 %v3006_v41, %v2444_v51  ;;  %v2481_v20 = vor.u32 %v3012_v15, %v2478_v16  ;;  %v2556_v34 = vld [vmem:[#allocation7 + $0x260] sm:$0xf]  ;;  %v3070_v51 = vld [vmem:[#allocation7 + $0x38c] sm:$0xf0]  ;;  %v2606_v22 = vld [vmem:[#allocation7 + $0x2d0] sm:$0xf0] }
  0x5e   :  { %1453 = vmatpush.bf16.msra.mxu3 %v2749_v32  ;;  %v2462_v32 = vld [vmem:[#allocation7 + $0x1b0] sm:$0xf0]  ;;  %v2557_v37 = vor.u32 %v3034_v35, %v2556_v34  ;;  %v2701_v41 = vor.u32 %v3070_v51, %v2700_v40  ;;  %v2541_v47 = vor.u32 %v3030_v45, %v2540_v44  ;;  %v2684_v50 = vld [vmem:[#allocation7 + $0x360] sm:$0xf]  ;;  %v3066_v52 = vld [vmem:[#allocation7 + $0x36c] sm:$0xf0] }
  0x5f   :  { %1412 = vmatpush.bf16.msra.mxu0 %v2349_v21  ;;  %v2337_v21 = vor.u32 %v2976_v18, %v2334_v19  ;;  %v2685_v54 = vor.u32 %v3066_v52, %v2684_v50  ;;  %v2524_v58 = vld [vmem:[#allocation7 + $0x220] sm:$0xf]  ;;  %v3026_v59 = vld [vmem:[#allocation7 + $0x22c] sm:$0xf0]  ;;  %v2398_v18 = vld [vmem:[#allocation7 + $0x130] sm:$0xf0] }
  0x60   :  { %1426 = vmatpush.bf16.msra.mxu1 %v2477_v26  ;;  %v2318_v26 = vld [vmem:[#allocation7 + $0x90] sm:$0xf0]  ;;  %v2525_v61 = vor.u32 %v3026_v59, %v2524_v58  ;;  %v2668_v0 = vld [vmem:[#allocation7 + $0x340] sm:$0xf]  ;;  %v3062_v1 = vld [vmem:[#allocation7 + $0x34c] sm:$0xf0] }
  0x61   :  { %1440 = vmatpush.bf16.msra.mxu2 %v2605_v31  ;;  %v2321_v27 = vor.u32 %v2972_v24, %v2318_v26  ;;  %v2717_v31 = vor.u32 %v3074_v29, %v2716_v28  ;;  %v2508_v6 = vld [vmem:[#allocation7 + $0x200] sm:$0xf]  ;;  %v3022_v7 = vld [vmem:[#allocation7 + $0x20c] sm:$0xf0]  ;;  %v2382_v28 = vld [vmem:[#allocation7 + $0x110] sm:$0xf0] }
  0x62   :  { %1454 = vmatpush.bf16.msra.mxu3 %v2733_v42  ;;  %v3004_v42 = vld [vmem:[#allocation7 + $0x184] sm:$0xf]  ;;  %v2652_v15 = vld [vmem:[#allocation7 + $0x320] sm:$0xf]  ;;  %v3058_v16 = vld [vmem:[#allocation7 + $0x32c] sm:$0xf0] }
  0x63   :  { %1413 = vmatpush.bf16.msra.mxu0 %v2333_v33  ;;  %v2465_v33 = vor.u32 %v3008_v30, %v2462_v32  ;;  %v2653_v19 = vor.u32 %v3058_v16, %v2652_v15  ;;  %v2636_v24 = vld [vmem:[#allocation7 + $0x300] sm:$0xf]  ;;  %v3080_v29 = vld [vmem:[#allocation7 + $0x3e4] sm:$0xf]  ;;  %v2590_v34 = vld [vmem:[#allocation7 + $0x2b0] sm:$0xf0] }
  0x64   :  { %1427 = vmatpush.bf16.msra.mxu1 %v2461_v38  ;;  %v2302_v38 = vld [vmem:[#allocation7 + $0x70] sm:$0xf0]  ;;  %v3036_v40 = vld [vmem:[#allocation7 + $0x284] sm:$0xf] }
  0x65   :  { %1441 = vmatpush.bf16.msra.mxu2 %v2589_v43  ;;  %v2305_v39 = vor.u32 %v2968_v36, %v2302_v38  ;;  %v2446_v43 = vld [vmem:[#allocation7 + $0x190] sm:$0xf0]  ;;  %v3076_v36 = vld [vmem:[#allocation7 + $0x3c4] sm:$0xf] }
  0x66   :  { %1455 = vmatpush.bf16.msra.mxu3 %v2717_v31  ;;  %v2750_v31 = vld [vmem:[#allocation7 + $0x3f0] sm:$0xf0]  ;;  %v3068_v50 = vld [vmem:[#allocation7 + $0x384] sm:$0xf] }
  0x67   :  { %1414 = vmatpush.bf16.msra.mxu0 %v2317_v55  ;;  %v2449_v55 = vor.u32 %v3004_v42, %v2446_v43  ;;  %v2753_v32 = vor.u32 %v3080_v29, %v2750_v31  ;;  %v2574_v51 = vld [vmem:[#allocation7 + $0x290] sm:$0xf0]  ;;  %v3072_v42 = vld [vmem:[#allocation7 + $0x3a4] sm:$0xf]  ;;  %v2500_v31 = vld [vmem:[#allocation7 + $0x1e8] sm:$0xf] }
  0x68   :  { %1428 = vmatpush.bf16.msra.mxu1 %v2445_v46  ;;  %v2964_v46 = vld [vmem:[#allocation7 + $0x44] sm:$0xf]  ;;  %v2718_v43 = vld [vmem:[#allocation7 + $0x3b0] sm:$0xf0] }
  0x69   :  { %1442 = vmatpush.bf16.msra.mxu2 %v2573_v25  ;;  %v3054_v25 = vld [vmem:[#allocation7 + $0x30c] sm:$0xf0]  ;;  %v2721_v44 = vor.u32 %v3072_v42, %v2718_v43  ;;  %v2702_v52 = vld [vmem:[#allocation7 + $0x390] sm:$0xf0]  ;;  %v3020_v16 = vld [vmem:[#allocation7 + $0x204] sm:$0xf] }
  0x6a   :  { %1456 = vmatpush.bf16.msra.mxu3 %v2701_v41  ;;  %v2637_v26 = vor.u32 %v3054_v25, %v2636_v24  ;;  %v2577_v41 = vor.u32 %v3036_v40, %v2574_v51  ;;  %v2526_v4 = vld [vmem:[#allocation7 + $0x230] sm:$0xf0]  ;;  %v2983_v25 = vld [vmem:[#allocation7 + $0xd4] sm:$0xf0] }
  0x6b   :  { %1415 = vmatpush.bf16.msra.mxu0 %v2301_v49  ;;  %v2289_v49 = vor.u32 %v2964_v46, %v2286_v48  ;;  %v3032_v46 = vld [vmem:[#allocation7 + $0x264] sm:$0xf]  ;;  %v2979_v40 = vld [vmem:[#allocation7 + $0xb4] sm:$0xf0] }
  0x6c   :  { %1429 = vmatpush.bf16.msra.mxu1 %v2429_v53  ;;  %v3000_v53 = vld [vmem:[#allocation7 + $0x164] sm:$0xf] }
  0x6d   :  { %1443 = vmatpush.bf16.msra.mxu2 %v2557_v37  ;;  %v2734_v37 = vld [vmem:[#allocation7 + $0x3d0] sm:$0xf0] }
  0x6e   :  { %1457 = vmatpush.bf16.msra.mxu3 %v2685_v54  ;;  %v2737_v38 = vor.u32 %v3076_v36, %v2734_v37  ;;  %v2705_v54 = vor.u32 %v3068_v50, %v2702_v52  ;;  %v3052_v36 = vld [vmem:[#allocation7 + $0x304] sm:$0xf]  ;;  %v2638_v37 = vld [vmem:[#allocation7 + $0x310] sm:$0xf0]  ;;  %v2468_v50 = vld [vmem:[#allocation7 + $0x1a8] sm:$0xf] }
  0x6f   :  { %1416 = vmatpush.bf16.msra.mxu0 %v2285_v57  ;;  %v2433_v57 = vor.u32 %v3000_v53, %v2430_v56  ;;  %v3028_v56 = vld [vmem:[#allocation7 + $0x244] sm:$0xf]  ;;  %v2641_v51 = vor.u32 %v3052_v36, %v2638_v37  ;;  %v3011_v52 = vld [vmem:[#allocation7 + $0x1b4] sm:$0xf0] }
  0x70   :  { %1430 = vmatpush.bf16.msra.mxu1 %v2413_v60  ;;  %v2960_v60 = vld [vmem:[#allocation7 + $0x24] sm:$0xf] }
  0x71   :  { %1444 = vmatpush.bf16.msra.mxu2 %v2541_v47  ;;  %v2558_v47 = vld [vmem:[#allocation7 + $0x270] sm:$0xf0] }
  0x73   :  { %1417 = vmatpush.bf16.msra.mxu0 %v2269_v63  ;;  %v2273_v63 = vor.u32 %v2960_v60, %v2270_v62  ;;  %v3064_v60 = vld [vmem:[#allocation7 + $0x364] sm:$0xf] }
  0x74   :  { %1431 = vmatpush.bf16.msra.mxu1 %v2397_v3  ;;  %v2669_v3 = vor.u32 %v3062_v1, %v2668_v0 }
  0x75   :  { %1445 = vmatpush.bf16.msra.mxu2 %v2525_v61  ;;  %v2686_v61 = vld [vmem:[#allocation7 + $0x370] sm:$0xf0] }
  0x76   :  { %1458 = vmatpush.bf16.msra.mxu3 %v2669_v3  ;;  %v2689_v0 = vor.u32 %v3064_v60, %v2686_v61  ;;  %v3024_v3 = vld [vmem:[#allocation7 + $0x224] sm:$0xf]  ;;  %v2452_v61 = vld [vmem:[#allocation7 + $0x188] sm:$0xf] }
  0x77   :  { %1418 = vmatpush.bf16.msra.mxu0 %v2253_v9  ;;  %v2509_v9 = vor.u32 %v3022_v7, %v2508_v6  ;;  %v2529_v7 = vor.u32 %v3024_v3, %v2526_v4  ;;  %v2436_v4 = vld [vmem:[#allocation7 + $0x168] sm:$0xf] }
  0x78   :  { %1432 = vmatpush.bf16.msra.mxu1 %v2381_v11  ;;  %v3048_v11 = vld [vmem:[#allocation7 + $0x2e4] sm:$0xf] }
  0x79   :  { %1446 = vmatpush.bf16.msra.mxu2 %v2509_v9  ;;  %v3060_v9 = vld [vmem:[#allocation7 + $0x344] sm:$0xf] }
  0x7a   :  { %1459 = vmatpush.bf16.msra.mxu3 %v2653_v19 }
  0x7b   :  { %1467 = vmatpush.bf16.msrb.mxu0 %v2369_v10  ;;  %v2254_v10 = vld [vmem:[#allocation7 + $0x10] sm:$0xf0] }
  0x7c   :  { %1481 = vmatpush.bf16.msrb.mxu1 %v2497_v14  ;;  %v2257_v13 = vor.u32 %v2956_v8, %v2254_v10  ;;  %v2625_v14 = vor.u32 %v3048_v11, %v2622_v12  ;;  %v2670_v10 = vld [vmem:[#allocation7 + $0x350] sm:$0xf0] }
  0x7d   :  { %v2673_v15 = vor.u32 %v3060_v9, %v2670_v10 }
  0x7e   :  { %1495 = vmatpush.bf16.msrb.mxu2 %v2625_v14  ;;  %1460 = vmatpush.bf16.msra.mxu3 %v2637_v26  ;;  %v2987_v14 = vld [vmem:[#allocation7 + $0xf4] sm:$0xf0]  ;;  %v3056_v26 = vld [vmem:[#allocation7 + $0x324] sm:$0xf] }
  0x7f   :  { %1468 = vmatpush.bf16.msrb.mxu0 %v2353_v17  ;;  %v2992_v17 = vld [vmem:[#allocation7 + $0x124] sm:$0xf] }
  0x80   :  { %1482 = vmatpush.bf16.msrb.mxu1 %v2481_v20  ;;  %v2401_v20 = vor.u32 %v2992_v17, %v2398_v18  ;;  %v2510_v17 = vld [vmem:[#allocation7 + $0x210] sm:$0xf0] }
  0x81   :  { %v2513_v19 = vor.u32 %v3020_v16, %v2510_v17  ;;  %v2420_v16 = vld [vmem:[#allocation7 + $0x148] sm:$0xf]  ;;  %v2999_v17 = vld [vmem:[#allocation7 + $0x154] sm:$0xf0] }
  0x82   :  { %1509 = vmatpush.bf16.msrb.mxu3 %v2753_v32  ;;  %v3019_v32 = vld [vmem:[#allocation7 + $0x1f4] sm:$0xf0] }
  0x83   :  { %1469 = vmatpush.bf16.msrb.mxu0 %v2337_v21  ;;  %v3044_v21 = vld [vmem:[#allocation7 + $0x2c4] sm:$0xf]  ;;  %v2501_v42 = vor.u32 %v3019_v32, %v2500_v31  ;;  %v2404_v31 = vld [vmem:[#allocation7 + $0x128] sm:$0xf]  ;;  %v2995_v32 = vld [vmem:[#allocation7 + $0x134] sm:$0xf0] }
  0x84   :  { %1483 = vmatpush.bf16.msrb.mxu1 %v2465_v33  ;;  %v2609_v23 = vor.u32 %v3044_v21, %v2606_v22  ;;  %v3040_v33 = vld [vmem:[#allocation7 + $0x2a4] sm:$0xf]  ;;  %v2356_v22 = vld [vmem:[#allocation7 + $0xc8] sm:$0xf] }
  0x85   :  { %v2593_v35 = vor.u32 %v3040_v33, %v2590_v34 }
  0x86   :  { %1496 = vmatpush.bf16.msrb.mxu2 %v2609_v23  ;;  %1510 = vmatpush.bf16.msrb.mxu3 %v2737_v38  ;;  %v2340_v38 = vld [vmem:[#allocation7 + $0xa8] sm:$0xf] }
  0x87   :  { %1470 = vmatpush.bf16.msrb.mxu0 %v2321_v27  ;;  %v2988_v27 = vld [vmem:[#allocation7 + $0x104] sm:$0xf] }
  0x88   :  { %1484 = vmatpush.bf16.msrb.mxu1 %v2449_v55  ;;  %v2385_v30 = vor.u32 %v2988_v27, %v2382_v28  ;;  %v2654_v27 = vld [vmem:[#allocation7 + $0x330] sm:$0xf0] }
  0x8a   :  { %1497 = vmatpush.bf16.msrb.mxu2 %v2593_v35  ;;  %1511 = vmatpush.bf16.msrb.mxu3 %v2721_v44  ;;  %v2357_v35 = vor.u32 %v2983_v25, %v2356_v22  ;;  %v2484_v44 = vld [vmem:[#allocation7 + $0x1c8] sm:$0xf]  ;;  %v2985_v25 = vld [vmem:[#allocation7 + $0xec] sm:$0xf] }
  0x8b   :  { %1471 = vmatpush.bf16.msrb.mxu0 %v2305_v39  ;;  %v3363_v39 = vld [vmem:[#allocation10] sm:$0xf] }
  0x8c   :  { %1485 = vmatpush.bf16.msrb.mxu1 %v2433_v57  ;;  %v171_v55 = vperm.slane %v3363_v39, 0  ;;  %v2542_v57 = vld [vmem:[#allocation7 + $0x250] sm:$0xf0]  ;;  %v172_v59 = vperm.slane %v3363_v39, 1  ;;  %v174_v9 = vperm.slane %v3363_v39, 3 }
  0x8d   :  { %v2545_v58 = vor.u32 %v3028_v56, %v2542_v57  ;;  %v2469_v57 = vor.u32 %v3011_v52, %v2468_v50 }
  0x8e   :  { %1498 = vmatpush.bf16.msrb.mxu2 %v2577_v41  ;;  %1512 = vmatpush.bf16.msrb.mxu3 %v2705_v54  ;;  %v2971_v54 = vld [vmem:[#allocation7 + $0x74] sm:$0xf0] }
  0x8f   :  { %1472 = vmatpush.bf16.msrb.mxu0 %v2289_v49  ;;  %v2561_v49 = vor.u32 %v3032_v46, %v2558_v47  ;;  %v2324_v46 = vld [vmem:[#allocation7 + $0x88] sm:$0xf]  ;;  %v2975_v47 = vld [vmem:[#allocation7 + $0x94] sm:$0xf0] }
  0x90   :  { %1486 = vmatpush.bf16.msrb.mxu1 %v2417_v5 }
  0x92   :  { %1499 = vmatpush.bf16.msrb.mxu2 %v2561_v49  ;;  %1513 = vmatpush.bf16.msrb.mxu3 %v2689_v0  ;;  %v2325_v49 = vor.u32 %v2975_v47, %v2324_v46  ;;  %v2967_v0 = vld [vmem:[#allocation7 + $0x54] sm:$0xf0]  ;;  %v2756_v47 = vld [vmem:[#allocation7 + $0x3e8] sm:$0xf] }
  0x93   :  { %1473 = vmatpush.bf16.msrb.mxu0 %v2273_v63  ;;  %v2991_v46 = vld [vmem:[#allocation7 + $0x114] sm:$0xf0] }
  0x94   :  { %1487 = vmatpush.bf16.msrb.mxu1 %v2401_v20 }
  0x96   :  { %1500 = vmatpush.bf16.msrb.mxu2 %v2545_v58  ;;  %1514 = vmatpush.bf16.msrb.mxu3 %v2673_v15  ;;  %v173_v58 = vperm.slane %v3363_v39, 2  ;;  %v2374_v39 = vld [vmem:[#allocation7 + $0xf8] sm:$0xf0] }
  0x97   :  { %1474 = vmatpush.bf16.msrb.mxu0 %v2257_v13  ;;  %v2372_v13 = vld [vmem:[#allocation7 + $0xe8] sm:$0xf] }
  0x98   :  { %1488 = vmatpush.bf16.msrb.mxu1 %v2385_v30  ;;  %v2373_v21 = vor.u32 %v2987_v14, %v2372_v13  ;;  %v2657_v30 = vor.u32 %v3056_v26, %v2654_v27  ;;  %v2421_v27 = vor.u32 %v2999_v17, %v2420_v16  ;;  %v3075_v17 = vld [vmem:[#allocation7 + $0x3b4] sm:$0xf0] }
  0x9a   :  { %1501 = vmatpush.bf16.msrb.mxu2 %v2529_v7  ;;  %1515 = vmatpush.bf16.msrb.mxu3 %v2657_v30  ;;  %v2963_v7 = vld [vmem:[#allocation7 + $0x34] sm:$0xf0] }
  0x9e   :  { %1502 = vmatpush.bf16.msrb.mxu2 %v2513_v19  ;;  %1516 = vmatpush.bf16.msrb.mxu3 %v2641_v51  ;;  %v2260_v19 = vld [vmem:[#allocation7 + $0x8] sm:$0xf]  ;;  %v2358_v51 = vld [vmem:[#allocation7 + $0xd8] sm:$0xf0] }
  0xb7   :  { %v518_v45 = vpop.f32.mrf.mxu0 }
  0xb8   :  { %v532_v48 = vpop.f32.mrf.mxu1  ;;  %v519_v53 = vadd.f32 %v518_v45, %v171_v55  ;;  %v3015_v45 = vld [vmem:[#allocation7 + $0x1d4] sm:$0xf0] }
  0xba   :  { %v533_v62 = vadd.f32 %v532_v48, %v519_v53  ;;  %v2485_v48 = vor.u32 %v3015_v45, %v2484_v44  ;;  %v2308_v53 = vld [vmem:[#allocation7 + $0x68] sm:$0xf] }
  0xbb   :  { %v2309_v60 = vor.u32 %v2971_v54, %v2308_v53  ;;  %v2388_v44 = vld [vmem:[#allocation7 + $0x108] sm:$0xf]  ;;  %v3017_v53 = vld [vmem:[#allocation7 + $0x1ec] sm:$0xf]  ;;  %v2502_v54 = vld [vmem:[#allocation7 + $0x1f8] sm:$0xf0] }
  0xbc   :  { %v621_v11 = vmax.f32 %v533_v62, 0.0  ;;  %v3007_v62 = vld [vmem:[#allocation7 + $0x194] sm:$0xf0] }
  0xbf   :  { %v546_v63 = vpop.f32.mrf.mxu2  ;;  %v520_v1 = vpop.f32.mrf.mxu0 }
  0xc0   :  { %v560_v2 = vpop.f32.mrf.mxu3  ;;  %v521_v5 = vadd.f32 %v520_v1, %v171_v55  ;;  %v534_v6 = vpop.f32.mrf.mxu1  ;;  %v547_v8 = vadd.f32 %v546_v63, %v172_v59  ;;  %v2341_v55 = vor.u32 %v2979_v40, %v2340_v38  ;;  %v2292_v63 = vld [vmem:[#allocation7 + $0x48] sm:$0xf]  ;;  %v2453_v1 = vor.u32 %v3007_v62, %v2452_v61  ;;  %v3047_v38 = vld [vmem:[#allocation7 + $0x2d4] sm:$0xf0]  ;;  %v2981_v40 = vld [vmem:[#allocation7 + $0xcc] sm:$0xf] }
  0xc1   :  { %v2293_v3 = vor.u32 %v2967_v0, %v2292_v63  ;;  %v2361_v52 = vor.u32 %v2981_v40, %v2358_v51  ;;  %v2389_v62 = vor.u32 %v2991_v46, %v2388_v44  ;;  %v2505_v0 = vor.u32 %v3017_v53, %v2502_v54  ;;  %v2692_v40 = vld [vmem:[#allocation7 + $0x368] sm:$0xf]  ;;  %v2278_v46 = vld [vmem:[#allocation7 + $0x38] sm:$0xf0]  ;;  %v3063_v54 = vld [vmem:[#allocation7 + $0x354] sm:$0xf0] }
  0xc2   :  { %v535_v12 = vadd.f32 %v534_v6, %v521_v5  ;;  %v561_v20 = vadd.f32 %v560_v2, %v547_v8  ;;  %v3003_v5 = vld [vmem:[#allocation7 + $0x174] sm:$0xf0]  ;;  %v2276_v6 = vld [vmem:[#allocation7 + $0x28] sm:$0xf] }
  0xc3   :  { %v2277_v15 = vor.u32 %v2963_v7, %v2276_v6  ;;  %v3013_v6 = vld [vmem:[#allocation7 + $0x1cc] sm:$0xf]  ;;  %v2486_v7 = vld [vmem:[#allocation7 + $0x1d8] sm:$0xf0] }
  0xc4   :  { %v625_v18 = vmax.f32 %v535_v12, 0.0  ;;  %v622_v33 = vmax.f32 %v561_v20, 0.0  ;;  %v2437_v12 = vor.u32 %v3003_v5, %v2436_v4  ;;  %v2959_v20 = vld [vmem:[#allocation7 + $0x14] sm:$0xf0] }
  0xc5   :  { %v2261_v30 = vor.u32 %v2959_v20, %v2260_v19  ;;  %v2470_v19 = vld [vmem:[#allocation7 + $0x1b8] sm:$0xf0]  ;;  %v2969_v20 = vld [vmem:[#allocation7 + $0x6c] sm:$0xf] }
  0xc6   :  { %v3367_v23 = vpack.c.bf16 %v625_v18, %v621_v11 }
  0xc7   :  { %v548_v24 = vpop.f32.mrf.mxu2 }
  0xc8   :  { %v549_v28 = vadd.f32 %v548_v24, %v172_v59  ;;  %v562_v29 = vpop.f32.mrf.mxu3  ;;  %1419 = vmatmul.bf16.vlgmr.msra.gmra.mxu0 %v3367_v23  ;;  %v3051_v24 = vld [vmem:[#allocation7 + $0x2f4] sm:$0xf0] }
  0xc9   :  { %1523 = vmatpush.bf16.msra.mxu0 %v2373_v21  ;;  %v2628_v21 = vld [vmem:[#allocation7 + $0x2e8] sm:$0xf] }
  0xca   :  { %v563_v34 = vadd.f32 %v562_v29, %v549_v28 }
  0xcc   :  { %v626_v41 = vmax.f32 %v563_v34, 0.0  ;;  %v2377_v34 = vor.u32 %v2985_v25, %v2374_v39 }
  0xcd   :  { %1524 = vmatpush.bf16.msra.mxu0 %v2357_v35  ;;  %v2612_v35 = vld [vmem:[#allocation7 + $0x2c8] sm:$0xf] }
  0xce   :  { %v3370_v43 = vpack.c.bf16 %v626_v41, %v622_v33  ;;  %v2629_v33 = vor.u32 %v3051_v24, %v2628_v21  ;;  %v2613_v50 = vor.u32 %v3047_v38, %v2612_v35  ;;  %v2310_v21 = vld [vmem:[#allocation7 + $0x78] sm:$0xf0]  ;;  %v3035_v24 = vld [vmem:[#allocation7 + $0x274] sm:$0xf0] }
  0xcf   :  { %v3031_v35 = vld [vmem:[#allocation7 + $0x254] sm:$0xf0] }
  0xd0   :  { %1433 = vmatmul.bf16.vlgmr.msra.gmra.mxu1 %v3370_v43 }
  0xd1   :  { %1537 = vmatpush.bf16.msra.mxu1 %v2501_v42  ;;  %1525 = vmatpush.bf16.msra.mxu0 %v2341_v55  ;;  %v2405_v55 = vor.u32 %v2995_v32, %v2404_v31  ;;  %v2965_v32 = vld [vmem:[#allocation7 + $0x4c] sm:$0xf] }
  0xd5   :  { %1538 = vmatpush.bf16.msra.mxu1 %v2485_v48  ;;  %1526 = vmatpush.bf16.msra.mxu0 %v2325_v49  ;;  %v3083_v48 = vld [vmem:[#allocation7 + $0x3f4] sm:$0xf0] }
  0xd6   :  { %v2757_v63 = vor.u32 %v3083_v48, %v2756_v47  ;;  %v2532_v47 = vld [vmem:[#allocation7 + $0x228] sm:$0xf]  ;;  %v3027_v48 = vld [vmem:[#allocation7 + $0x234] sm:$0xf0] }
  0xd7   :  { %v574_v56 = vpop.f32.mrf.mxu0 }
  0xd8   :  { %v588_v59 = vpop.f32.mrf.mxu1  ;;  %1475 = vmatmul.bf16.vlgmr.msrb.gmra.mxu0 %v3367_v23  ;;  %v575_v2 = vadd.f32 %v574_v56, %v173_v58  ;;  %v2596_v56 = vld [vmem:[#allocation7 + $0x2a8] sm:$0xf] }
  0xd9   :  { %1539 = vmatpush.bf16.msra.mxu1 %v2469_v57  ;;  %1527 = vmatpush.bf16.msra.mxu0 %v2309_v60  ;;  %v3043_v57 = vld [vmem:[#allocation7 + $0x2b4] sm:$0xf0] }
  0xda   :  { %v589_v13 = vadd.f32 %v588_v59, %v575_v2  ;;  %v2342_v59 = vld [vmem:[#allocation7 + $0xb8] sm:$0xf0]  ;;  %v3079_v2 = vld [vmem:[#allocation7 + $0x3d4] sm:$0xf0]  ;;  %v2597_v4 = vor.u32 %v3043_v57, %v2596_v56  ;;  %v2997_v56 = vld [vmem:[#allocation7 + $0x14c] sm:$0xf] }
  0xdb   :  { %v2422_v57 = vld [vmem:[#allocation7 + $0x158] sm:$0xf0] }
  0xdc   :  { %v623_v28 = vmax.f32 %v589_v13, 0.0  ;;  %v2489_v13 = vor.u32 %v3013_v6, %v2486_v7  ;;  %v3059_v6 = vld [vmem:[#allocation7 + $0x334] sm:$0xf0]  ;;  %v2993_v7 = vld [vmem:[#allocation7 + $0x12c] sm:$0xf] }
  0xdd   :  { %1540 = vmatpush.bf16.msra.mxu1 %v2453_v1  ;;  %1528 = vmatpush.bf16.msra.mxu0 %v2293_v3  ;;  %v2740_v1 = vld [vmem:[#allocation7 + $0x3c8] sm:$0xf] }
  0xdf   :  { %v602_v8 = vpop.f32.mrf.mxu2  ;;  %v576_v11 = vpop.f32.mrf.mxu0 }
  0xe0   :  { %v616_v10 = vpop.f32.mrf.mxu3  ;;  %v577_v14 = vadd.f32 %v576_v11, %v173_v58  ;;  %v590_v18 = vpop.f32.mrf.mxu1  ;;  %1489 = vmatmul.bf16.vlgmr.msrb.gmra.mxu1 %v3370_v43  ;;  %v603_v26 = vadd.f32 %v602_v8, %v174_v9  ;;  %v2977_v58 = vld [vmem:[#allocation7 + $0xac] sm:$0xf]  ;;  %v2580_v8 = vld [vmem:[#allocation7 + $0x288] sm:$0xf]  ;;  %v2326_v11 = vld [vmem:[#allocation7 + $0x98] sm:$0xf0] }
  0xe1   :  { %1541 = vmatpush.bf16.msra.mxu1 %v2437_v12  ;;  %1529 = vmatpush.bf16.msra.mxu0 %v2277_v15  ;;  %v2345_v5 = vor.u32 %v2977_v58, %v2342_v59  ;;  %v2741_v12 = vor.u32 %v3079_v2, %v2740_v1  ;;  %v2533_v58 = vor.u32 %v3027_v48, %v2532_v47  ;;  %v2957_v59 = vld [vmem:[#allocation7 + $0xc] sm:$0xf]  ;;  %v2630_v2 = vld [vmem:[#allocation7 + $0x2f8] sm:$0xf0] }
  0xe2   :  { %v591_v22 = vadd.f32 %v590_v18, %v577_v14  ;;  %v617_v41 = vadd.f32 %v616_v10, %v603_v26  ;;  %v2973_v10 = vld [vmem:[#allocation7 + $0x8c] sm:$0xf]  ;;  %v2724_v14 = vld [vmem:[#allocation7 + $0x3a8] sm:$0xf]  ;;  %v2534_v48 = vld [vmem:[#allocation7 + $0x238] sm:$0xf0] }
  0xe3   :  { %v2329_v16 = vor.u32 %v2973_v10, %v2326_v11  ;;  %v3009_v18 = vld [vmem:[#allocation7 + $0x1ac] sm:$0xf]  ;;  %v2725_v25 = vor.u32 %v3075_v17, %v2724_v14  ;;  %v2708_v26 = vld [vmem:[#allocation7 + $0x388] sm:$0xf]  ;;  %v2614_v14 = vld [vmem:[#allocation7 + $0x2d8] sm:$0xf0] }
  0xe4   :  { %v627_v29 = vmax.f32 %v591_v22, 0.0  ;;  %v624_v60 = vmax.f32 %v617_v41, 0.0  ;;  %v2564_v22 = vld [vmem:[#allocation7 + $0x268] sm:$0xf]  ;;  %v2473_v39 = vor.u32 %v3009_v18, %v2470_v19  ;;  %v3067_v41 = vld [vmem:[#allocation7 + $0x374] sm:$0xf0] }
  0xe5   :  { %1542 = vmatpush.bf16.msra.mxu1 %v2421_v27  ;;  %1530 = vmatpush.bf16.msra.mxu0 %v2261_v30  ;;  %v2313_v27 = vor.u32 %v2969_v20, %v2310_v21  ;;  %v2454_v30 = vld [vmem:[#allocation7 + $0x198] sm:$0xf0]  ;;  %v2565_v31 = vor.u32 %v3035_v24, %v2564_v22  ;;  %v3049_v1 = vld [vmem:[#allocation7 + $0x2ec] sm:$0xf] }
  0xe6   :  { %v3377_v36 = vpack.c.bf16 %v627_v29, %v623_v28  ;;  %v3071_v28 = vld [vmem:[#allocation7 + $0x394] sm:$0xf0]  ;;  %v3005_v29 = vld [vmem:[#allocation7 + $0x18c] sm:$0xf]  ;;  %v2633_v10 = vor.u32 %v3049_v1, %v2630_v2  ;;  %v2390_v18 = vld [vmem:[#allocation7 + $0x118] sm:$0xf0] }
  0xe7   :  { %v604_v37 = vpop.f32.mrf.mxu2  ;;  %v2457_v38 = vor.u32 %v3005_v29, %v2454_v30  ;;  %v2989_v17 = vld [vmem:[#allocation7 + $0x10c] sm:$0xf]  ;;  %v2758_v20 = vld [vmem:[#allocation7 + $0x3f8] sm:$0xf0]  ;;  %v3090_v2 = vld [vmem:[#allocation8 + $0x30] sm:$0xff] }
  0xe8   :  { %v605_v42 = vadd.f32 %v604_v37, %v174_v9  ;;  %v618_v45 = vpop.f32.mrf.mxu3  ;;  %1447 = vmatmul.bf16.vlgmr.msra.gmra.mxu2 %v3377_v36  ;;  %1531 = vmatmul.bf16.vlgmr.msra.gmra.mxu0 %v3367_v23  ;;  %v3039_v9 = vld [vmem:[#allocation7 + $0x294] sm:$0xf0]  ;;  %v2709_v37 = vor.u32 %v3071_v28, %v2708_v26  ;;  %v3081_v19 = vld [vmem:[#allocation7 + $0x3ec] sm:$0xf]  ;;  %v2393_v24 = vor.u32 %v2989_v17, %v2390_v18  ;;  %v2742_v28 = vld [vmem:[#allocation7 + $0x3d8] sm:$0xf0] }
  0xe9   :  { %1551 = vmatpush.bf16.msra.mxu2 %v2629_v33  ;;  %1579 = vmatpush.bf16.msrb.mxu0 %v2377_v34  ;;  %v2581_v15 = vor.u32 %v3039_v9, %v2580_v8  ;;  %v2294_v33 = vld [vmem:[#allocation7 + $0x58] sm:$0xf0]  ;;  %v2548_v34 = vld [vmem:[#allocation7 + $0x248] sm:$0xf]  ;;  %v2761_v26 = vor.u32 %v3081_v19, %v2758_v20  ;;  %v3037_v30 = vld [vmem:[#allocation7 + $0x28c] sm:$0xf] }
  0xea   :  { %v619_v49 = vadd.f32 %v618_v45, %v605_v42  ;;  %1543 = vmatpush.bf16.msra.mxu1 %v2405_v55  ;;  %v2297_v51 = vor.u32 %v2965_v32, %v2294_v33  ;;  %v3001_v42 = vld [vmem:[#allocation7 + $0x16c] sm:$0xf]  ;;  %v2438_v55 = vld [vmem:[#allocation7 + $0x178] sm:$0xf0]  ;;  %v2549_v44 = vor.u32 %v3031_v35, %v2548_v34  ;;  %v3106_v17 = vld [vmem:[#allocation8 + $0xb0] sm:$0xff] }
  0xeb   :  { %v2961_v45 = vld [vmem:[#allocation7 + $0x2c] sm:$0xf]  ;;  %v2406_v8 = vld [vmem:[#allocation7 + $0x138] sm:$0xf0]  ;;  %v3396_v20 = vld [vmem:[%s3416_s5] sm:$0xf] }
  0xec   :  { %v628_v61 = vmax.f32 %v619_v49, 0.0  ;;  %v2693_v49 = vor.u32 %v3067_v41, %v2692_v40  ;;  %v2281_v53 = vor.u32 %v2961_v45, %v2278_v46  ;;  %v3073_v33 = vld [vmem:[#allocation7 + $0x3ac] sm:$0xf]  ;;  %v2726_v34 = vld [vmem:[#allocation7 + $0x3b8] sm:$0xf0] }
  0xed   :  { %1552 = vmatpush.bf16.msra.mxu2 %v2613_v50  ;;  %1580 = vmatpush.bf16.msrb.mxu0 %v2361_v52  ;;  %v2441_v50 = vor.u32 %v3001_v42, %v2438_v55  ;;  %v2676_v52 = vld [vmem:[#allocation7 + $0x348] sm:$0xf]  ;;  %v3069_v40 = vld [vmem:[#allocation7 + $0x38c] sm:$0xf]  ;;  %v2550_v55 = vld [vmem:[#allocation7 + $0x258] sm:$0xf0] }
  0xee   :  { %v3381_v3 = vpack.c.bf16 %v628_v61, %v624_v60  ;;  %1544 = vmatpush.bf16.msra.mxu1 %v2389_v62  ;;  %v2262_v60 = vld [vmem:[#allocation7 + $0x18] sm:$0xf0]  ;;  %v2516_v61 = vld [vmem:[#allocation7 + $0x208] sm:$0xf]  ;;  %v3023_v62 = vld [vmem:[#allocation7 + $0x214] sm:$0xf0] }
  0xef   :  { %v2517_v9 = vor.u32 %v3023_v62, %v2516_v61  ;;  %v3029_v42 = vld [vmem:[#allocation7 + $0x24c] sm:$0xf]  ;;  %v2694_v46 = vld [vmem:[#allocation7 + $0x378] sm:$0xf0] }
  0xf0   :  { %1461 = vmatmul.bf16.vlgmr.msra.gmra.mxu3 %v3381_v3  ;;  %v3065_v45 = vld [vmem:[#allocation7 + $0x36c] sm:$0xf]  ;;  %v3091_v1 = vld [vmem:[#allocation8 + $0x38] sm:$0xff] }
  0xf1   :  { %1565 = vmatpush.bf16.msra.mxu3 %v2757_v63  ;;  %1553 = vmatpush.bf16.msra.mxu2 %v2597_v4  ;;  %v2677_v63 = vor.u32 %v3063_v54, %v2676_v52  ;;  %v2660_v4 = vld [vmem:[#allocation7 + $0x328] sm:$0xf]  ;;  %v3025_v47 = vld [vmem:[#allocation7 + $0x22c] sm:$0xf]  ;;  %v2678_v52 = vld [vmem:[#allocation7 + $0x358] sm:$0xf0] }
  0xf2   :  { %1593 = vmatpush.bf16.msrb.mxu1 %v2505_v0  ;;  %1581 = vmatpush.bf16.msrb.mxu0 %v2345_v5  ;;  %v2425_v0 = vor.u32 %v2997_v56, %v2422_v57  ;;  %v2265_v5 = vor.u32 %v2957_v59, %v2262_v60  ;;  %v2661_v11 = vor.u32 %v3059_v6, %v2660_v4  ;;  %v3021_v54 = vld [vmem:[#allocation7 + $0x20c] sm:$0xf]  ;;  %v2518_v56 = vld [vmem:[#allocation7 + $0x218] sm:$0xf0] }
  0xf3   :  { %1545 = vmatmul.bf16.vlgmr.msra.gmra.mxu1 %v3370_v43  ;;  %v2662_v59 = vld [vmem:[#allocation7 + $0x338] sm:$0xf0]  ;;  %v2521_v60 = vor.u32 %v3021_v54, %v2518_v56  ;;  %v3053_v62 = vld [vmem:[#allocation7 + $0x30c] sm:$0xf] }
  0xf4   :  { %v3089_v4 = vld [vmem:[#allocation8 + $0x28] sm:$0xff]  ;;  %v3087_v6 = vld [vmem:[#allocation8 + $0x18] sm:$0xff] }
  0xf5   :  { %1566 = vmatpush.bf16.msra.mxu3 %v2741_v12  ;;  %1554 = vmatpush.bf16.msra.mxu2 %v2581_v15  ;;  %v2409_v12 = vor.u32 %v2993_v7, %v2406_v8  ;;  %v2644_v15 = vld [vmem:[#allocation7 + $0x308] sm:$0xf]  ;;  %v3099_v7 = vld [vmem:[#allocation8 + $0x78] sm:$0xff]  ;;  %v3086_v8 = vld [vmem:[#allocation8 + $0x10] sm:$0xff] }
  0xf6   :  { %1594 = vmatpush.bf16.msrb.mxu1 %v2489_v13  ;;  %1582 = vmatpush.bf16.msrb.mxu0 %v2329_v16  ;;  %v3045_v13 = vld [vmem:[#allocation7 + $0x2cc] sm:$0xf]  ;;  %v3055_v16 = vld [vmem:[#allocation7 + $0x314] sm:$0xf0] }
  0xf7   :  { %v2617_v21 = vor.u32 %v3045_v13, %v2614_v14  ;;  %v2645_v22 = vor.u32 %v3055_v16, %v2644_v15  ;;  %v3095_v13 = vld [vmem:[#allocation8 + $0x58] sm:$0xff]  ;;  %v3094_v16 = vld [vmem:[#allocation8 + $0x50] sm:$0xff]  ;;  %v3093_v18 = vld [vmem:[#allocation8 + $0x48] sm:$0xff] }
  0xf8   :  { %1503 = vmatmul.bf16.vlgmr.msrb.gmra.mxu2 %v3377_v36  ;;  %v3107_v14 = vld [vmem:[#allocation8 + $0xb8] sm:$0xff]  ;;  %v3105_v19 = vld [vmem:[#allocation8 + $0xa8] sm:$0xff] }
  0xf9   :  { %1567 = vmatpush.bf16.msra.mxu3 %v2725_v25  ;;  %1555 = vmatpush.bf16.msra.mxu2 %v2565_v31  ;;  %v3041_v25 = vld [vmem:[#allocation7 + $0x2ac] sm:$0xf]  ;;  %v2582_v31 = vld [vmem:[#allocation7 + $0x298] sm:$0xf0] }
  0xfa   :  { %1595 = vmatpush.bf16.msrb.mxu1 %v2473_v39  ;;  %1583 = vmatpush.bf16.msrb.mxu0 %v2313_v27  ;;  %v2598_v39 = vld [vmem:[#allocation7 + $0x2b8] sm:$0xf0]  ;;  %v3077_v27 = vld [vmem:[#allocation7 + $0x3cc] sm:$0xf]  ;;  %v2585_v35 = vor.u32 %v3037_v30, %v2582_v31 }
  0xfb   :  { %v2601_v29 = vor.u32 %v3041_v25, %v2598_v39  ;;  %v2745_v32 = vor.u32 %v3077_v27, %v2742_v28  ;;  %v3092_v39 = vld [vmem:[#allocation8 + $0x40] sm:$0xff]  ;;  %v3103_v28 = vld [vmem:[#allocation8 + $0x98] sm:$0xff]  ;;  %v3113_v56 = vld [vmem:[#allocation8 + $0xe8] sm:$0xff] }
  0xfd   :  { %1568 = vmatpush.bf16.msra.mxu3 %v2709_v37  ;;  %1556 = vmatpush.bf16.msra.mxu2 %v2549_v44  ;;  %v2566_v37 = vld [vmem:[#allocation7 + $0x278] sm:$0xf0] }
  0xfe   :  { %1596 = vmatpush.bf16.msrb.mxu1 %v2457_v38  ;;  %1584 = vmatpush.bf16.msrb.mxu0 %v2297_v51  ;;  %v2729_v38 = vor.u32 %v3073_v33, %v2726_v34  ;;  %v2710_v51 = vld [vmem:[#allocation7 + $0x398] sm:$0xf0]  ;;  %v3102_v34 = vld [vmem:[#allocation8 + $0x90] sm:$0xff] }
  0xff   :  { %v2713_v44 = vor.u32 %v3069_v40, %v2710_v51  ;;  %v3101_v51 = vld [vmem:[#allocation8 + $0x88] sm:$0xff] }
 0x100   :  { %1517 = vmatmul.bf16.vlgmr.msrb.gmra.mxu3 %v3381_v3 }
 0x101   :  { %1569 = vmatpush.bf16.msra.mxu3 %v2693_v49  ;;  %1557 = vmatpush.bf16.msra.mxu2 %v2533_v58  ;;  %v2697_v49 = vor.u32 %v3065_v45, %v2694_v46  ;;  %v3057_v58 = vld [vmem:[#allocation7 + $0x32c] sm:$0xf]  ;;  %v3100_v46 = vld [vmem:[#allocation8 + $0x80] sm:$0xff] }
 0x102   :  { %1597 = vmatpush.bf16.msrb.mxu1 %v2441_v50  ;;  %1585 = vmatpush.bf16.msrb.mxu0 %v2281_v53  ;;  %v3061_v50 = vld [vmem:[#allocation7 + $0x34c] sm:$0xf]  ;;  %v2537_v53 = vor.u32 %v3025_v47, %v2534_v48  ;;  %v2665_v61 = vor.u32 %v3057_v58, %v2662_v59  ;;  %v764_v47 = vperm.slane %v3396_v20, 1 }
 0x103   :  { %v2681_v57 = vor.u32 %v3061_v50, %v2678_v52  ;;  %v3114_v52 = vld [vmem:[#allocation8 + $0xf0] sm:$0xff] }
 0x105   :  { %1570 = vmatpush.bf16.msra.mxu3 %v2677_v63  ;;  %1558 = vmatpush.bf16.msra.mxu2 %v2517_v9  ;;  %v2646_v63 = vld [vmem:[#allocation7 + $0x318] sm:$0xf0]  ;;  %v3098_v9 = vld [vmem:[#allocation8 + $0x70] sm:$0xff] }
 0x106   :  { %1598 = vmatpush.bf16.msrb.mxu1 %v2425_v0  ;;  %1586 = vmatpush.bf16.msrb.mxu0 %v2265_v5  ;;  %v2649_v0 = vor.u32 %v3053_v62, %v2646_v63  ;;  %v3088_v5 = vld [vmem:[#allocation8 + $0x20] sm:$0xff] }
 0x108   :  { %1559 = vmatmul.bf16.vlgmr.msra.gmra.mxu2 %v3377_v36 }
 0x109   :  { %1607 = vmatpush.bf16.msrb.mxu2 %v2633_v10  ;;  %1571 = vmatpush.bf16.msra.mxu3 %v2661_v11  ;;  %v3097_v10 = vld [vmem:[#allocation8 + $0x68] sm:$0xff]  ;;  %v3096_v11 = vld [vmem:[#allocation8 + $0x60] sm:$0xff] }
 0x10a   :  { %1599 = vmatpush.bf16.msrb.mxu1 %v2409_v12  ;;  %1587 = vmatmul.bf16.vlgmr.msrb.gmra.mxu0 %v3367_v23  ;;  %v3033_v23 = vld [vmem:[#allocation7 + $0x26c] sm:$0xf] }
 0x10b   :  { %v2569_v41 = vor.u32 %v3033_v23, %v2566_v37  ;;  %1907 = vmatpush.bf16.msra.mxu0 %v3091_v1  ;;  %v3112_v1 = vld [vmem:[#allocation8 + $0xe0] sm:$0xff] }
 0x10d   :  { %1608 = vmatpush.bf16.msrb.mxu2 %v2617_v21  ;;  %1572 = vmatpush.bf16.msra.mxu3 %v2645_v22 }
 0x10e   :  { %1600 = vmatpush.bf16.msrb.mxu1 %v2393_v24  ;;  %v763_v24 = vperm.slane %v3396_v20, 0 }
 0x10f   :  { %1908 = vmatpush.bf16.msra.mxu0 %v3090_v2 }
 0x110   :  { %1573 = vmatmul.bf16.vlgmr.msra.gmra.mxu3 %v3381_v3 }
 0x111   :  { %1621 = vmatpush.bf16.msrb.mxu3 %v2761_v26  ;;  %1601 = vmatmul.bf16.vlgmr.msrb.gmra.mxu1 %v3370_v43  ;;  %v2553_v43 = vor.u32 %v3029_v42, %v2550_v55  ;;  %v3104_v26 = vld [vmem:[#allocation8 + $0xa0] sm:$0xff] }
 0x112   :  { %1609 = vmatpush.bf16.msrb.mxu2 %v2601_v29  ;;  %1921 = vmatpush.bf16.msra.mxu1 %v3099_v7 }
 0x113   :  { %1909 = vmatpush.bf16.msra.mxu0 %v3089_v4 }
 0x115   :  { %1622 = vmatpush.bf16.msrb.mxu3 %v2745_v32 }
 0x116   :  { %1610 = vmatpush.bf16.msrb.mxu2 %v2585_v35  ;;  %1922 = vmatpush.bf16.msra.mxu1 %v3098_v9  ;;  %v3111_v9 = vld [vmem:[#allocation8 + $0xd8] sm:$0xff] }
 0x117   :  { %1910 = vmatpush.bf16.msra.mxu0 %v3088_v5 }
 0x119   :  { %1623 = vmatpush.bf16.msrb.mxu3 %v2729_v38 }
 0x11a   :  { %1611 = vmatpush.bf16.msrb.mxu2 %v2569_v41  ;;  %1923 = vmatpush.bf16.msra.mxu1 %v3097_v10  ;;  %v765_v10 = vperm.slane %v3396_v20, 2 }
 0x11b   :  { %1911 = vmatpush.bf16.msra.mxu0 %v3087_v6 }
 0x11d   :  { %1624 = vmatpush.bf16.msrb.mxu3 %v2713_v44 }
 0x11e   :  { %1612 = vmatpush.bf16.msrb.mxu2 %v2553_v43  ;;  %1924 = vmatpush.bf16.msra.mxu1 %v3096_v11  ;;  %v3115_v43 = vld [vmem:[#allocation8 + $0xf8] sm:$0xff] }
 0x11f   :  { %1912 = vmatpush.bf16.msra.mxu0 %v3086_v8 }
 0x121   :  { %1625 = vmatpush.bf16.msrb.mxu3 %v2697_v49 }
 0x122   :  { %1613 = vmatpush.bf16.msrb.mxu2 %v2537_v53  ;;  %1925 = vmatpush.bf16.msra.mxu1 %v3095_v13 }
 0x125   :  { %1626 = vmatpush.bf16.msrb.mxu3 %v2681_v57 }
 0x126   :  { %1614 = vmatpush.bf16.msrb.mxu2 %v2521_v60  ;;  %1926 = vmatpush.bf16.msra.mxu1 %v3094_v16 }
 0x129   :  { %1627 = vmatpush.bf16.msrb.mxu3 %v2665_v61  ;;  %1615 = vmatmul.bf16.vlgmr.msrb.gmra.mxu2 %v3377_v36  ;;  %v3085_v36 = vld [vmem:[#allocation8 + $0x8] sm:$0xff] }
 0x12a   :  { %1913 = vmatpush.bf16.msra.mxu0 %v3085_v36  ;;  %1935 = vmatpush.bf16.msra.mxu2 %v3107_v14 }
 0x12b   :  { %1927 = vmatpush.bf16.msra.mxu1 %v3093_v18 }
 0x12d   :  { %1628 = vmatpush.bf16.msrb.mxu3 %v2649_v0 }
 0x12e   :  { %1936 = vmatpush.bf16.msra.mxu2 %v3106_v17 }
 0x12f   :  { %1928 = vmatpush.bf16.msra.mxu1 %v3092_v39 }
 0x130   :  { %1629 = vmatmul.bf16.vlgmr.msrb.gmra.mxu3 %v3381_v3  ;;  %v3084_v3 = vld [vmem:[#allocation8] sm:$0xff] }
 0x131   :  { %1914 = vmatpush.bf16.msra.mxu0 %v3084_v3  ;;  %1949 = vmatpush.bf16.msra.mxu3 %v3115_v43  ;;  %v3110_v3 = vld [vmem:[#allocation8 + $0xd0] sm:$0xff] }
 0x132   :  { %1937 = vmatpush.bf16.msra.mxu2 %v3105_v19 }
 0x135   :  { %1950 = vmatpush.bf16.msra.mxu3 %v3114_v52 }
 0x136   :  { %1938 = vmatpush.bf16.msra.mxu2 %v3104_v26 }
 0x139   :  { %1951 = vmatpush.bf16.msra.mxu3 %v3113_v56 }
 0x13a   :  { %1939 = vmatpush.bf16.msra.mxu2 %v3103_v28 }
 0x13d   :  { %1952 = vmatpush.bf16.msra.mxu3 %v3112_v1 }
 0x13e   :  { %1940 = vmatpush.bf16.msra.mxu2 %v3102_v34 }
 0x141   :  { %1953 = vmatpush.bf16.msra.mxu3 %v3111_v9 }
 0x142   :  { %1941 = vmatpush.bf16.msra.mxu2 %v3101_v51 }
 0x145   :  { %v1420_v12 = vpop.f32.mrf.mxu0  ;;  %1954 = vmatpush.bf16.msra.mxu3 %v3110_v3 }
 0x146   :  { %v1421_v27 = vadd.f32 %v1420_v12, %v763_v24  ;;  %1942 = vmatpush.bf16.msra.mxu2 %v3100_v46 }
 0x14d   :  { %v1434_v15 = vpop.f32.mrf.mxu1  ;;  %v1422_v21 = vpop.f32.mrf.mxu0 }
 0x14e   :  { %v1435_v31 = vadd.f32 %v1434_v15, %v1421_v27  ;;  %v1423_v32 = vadd.f32 %v1422_v21, %v763_v24  ;;  %v3109_v15 = vld [vmem:[#allocation8 + $0xc8] sm:$0xff] }
 0x14f   :  { %1955 = vmatpush.bf16.msra.mxu3 %v3109_v15 }
 0x155   :  { %v1436_v25 = vpop.f32.mrf.mxu1  ;;  %v1476_v33 = vpop.f32.mrf.mxu0 }
 0x156   :  { %v1437_v35 = vadd.f32 %v1436_v25, %v1423_v32  ;;  %v1477_v54 = vadd.f32 %v1476_v33, %v764_v47  ;;  %v766_v33 = vperm.slane %v3396_v20, 3  ;;  %v3128_v20 = vld [vmem:[%s3417_s6] ss:$0 sm:$0xff] }
 0x15d   :  { %v1490_v23 = vpop.f32.mrf.mxu1  ;;  %v1478_v48 = vpop.f32.mrf.mxu0 }
 0x15e   :  { %v1491_v58 = vadd.f32 %v1490_v23, %v1477_v54  ;;  %v1479_v59 = vadd.f32 %v1478_v48, %v764_v47 }
 0x165   :  { %v1492_v50 = vpop.f32.mrf.mxu1  ;;  %v1532_v62 = vpop.f32.mrf.mxu0 }
 0x166   :  { %v1493_v60 = vadd.f32 %v1492_v50, %v1479_v59  ;;  %v1533_v13 = vadd.f32 %v1532_v62, %v765_v10 }
 0x16b   :  { %v1448_v22 = vpop.f32.mrf.mxu2 }
 0x16c   :  { %v1449_v37 = vadd.f32 %v1448_v22, %v1435_v31  ;;  %v3108_v22 = vld [vmem:[#allocation8 + $0xc0] sm:$0xff] }
 0x16d   :  { %v1534_v11 = vpop.f32.mrf.mxu0  ;;  %1956 = vmatpush.bf16.msra.mxu3 %v3108_v22 }
 0x16e   :  { %v1535_v17 = vadd.f32 %v1534_v11, %v765_v10 }
 0x170   :  { %v1546_v4 = vpop.f32.mrf.mxu1 }
 0x171   :  { %v1547_v16 = vadd.f32 %v1546_v4, %v1533_v13 }
 0x173   :  { %v1462_v29 = vpop.f32.mrf.mxu3  ;;  %v1450_v30 = vpop.f32.mrf.mxu2 }
 0x174   :  { %v1463_v38 = vadd.f32 %v1462_v29, %v1449_v37  ;;  %v1451_v40 = vadd.f32 %v1450_v30, %v1437_v35 }
 0x176   :  { %v1635_v44 = vmax.f32 %v1463_v38, 0.0 }
 0x178   :  { %v1548_v14 = vpop.f32.mrf.mxu1 }
 0x179   :  { %v1549_v19 = vadd.f32 %v1548_v14, %v1535_v17 }
 0x17b   :  { %v1464_v41 = vpop.f32.mrf.mxu3  ;;  %v1504_v55 = vpop.f32.mrf.mxu2 }
 0x17c   :  { %v1465_v42 = vadd.f32 %v1464_v41, %v1451_v40  ;;  %v1505_v61 = vadd.f32 %v1504_v55, %v1491_v58 }
 0x17e   :  { %v1639_v45 = vmax.f32 %v1465_v42, 0.0 }
 0x180   :  { %v1643_v49 = vpack.c.bf16 %v1639_v45, %v1635_v44 }
 0x182   :  { %1915 = vmatmul.bf16.vlgmr.msra.gmra.mxu0 %v1643_v49 }
 0x183   :  { %v1518_v53 = vpop.f32.mrf.mxu3  ;;  %v1506_v57 = vpop.f32.mrf.mxu2 }
 0x184   :  { %v1519_v63 = vadd.f32 %v1518_v53, %v1505_v61  ;;  %v1507_v0 = vadd.f32 %v1506_v57, %v1493_v60 }
 0x186   :  { %v1636_v6 = vmax.f32 %v1519_v63, 0.0 }
 0x187   :  { %v1588_v30 = vpop.f32.mrf.mxu0 }
 0x188   :  { %v1589_v23 = vadd.f32 %v1588_v30, %v766_v33 }
 0x18b   :  { %v1520_v2 = vpop.f32.mrf.mxu3  ;;  %v1560_v8 = vpop.f32.mrf.mxu2 }
 0x18c   :  { %v1521_v5 = vadd.f32 %v1520_v2, %v1507_v0  ;;  %v1561_v21 = vadd.f32 %v1560_v8, %v1547_v16 }
 0x18e   :  { %v1640_v7 = vmax.f32 %v1521_v5, 0.0  ;;  %v1602_v31 = vpop.f32.mrf.mxu1 }
 0x18f   :  { %v1590_v34 = vpop.f32.mrf.mxu0  ;;  %v1603_v38 = vadd.f32 %v1602_v31, %v1589_v23 }
 0x190   :  { %v1644_v36 = vpack.c.bf16 %v1640_v7, %v1636_v6  ;;  %v1591_v40 = vadd.f32 %v1590_v34, %v766_v33 }
 0x192   :  { %1929 = vmatmul.bf16.vlgmr.msra.gmra.mxu1 %v1644_v36 }
 0x193   :  { %v1574_v12 = vpop.f32.mrf.mxu3  ;;  %v1562_v18 = vpop.f32.mrf.mxu2 }
 0x194   :  { %v1575_v24 = vadd.f32 %v1574_v12, %v1561_v21  ;;  %v1563_v25 = vadd.f32 %v1562_v18, %v1549_v19 }
 0x196   :  { %v1637_v27 = vmax.f32 %v1575_v24, 0.0  ;;  %v1604_v37 = vpop.f32.mrf.mxu1 }
 0x197   :  { %v1605_v41 = vadd.f32 %v1604_v37, %v1591_v40 }
 0x19b   :  { %v1576_v39 = vpop.f32.mrf.mxu3 }
 0x19c   :  { %v1577_v26 = vadd.f32 %v1576_v39, %v1563_v25 }
 0x19e   :  { %v1641_v28 = vmax.f32 %v1577_v26, 0.0 }
 0x1a0   :  { %v1645_v29 = vpack.c.bf16 %v1641_v28, %v1637_v27 }
 0x1a2   :  { %1943 = vmatmul.bf16.vlgmr.msra.gmra.mxu2 %v1645_v29 }
 0x1ac   :  { %v1616_v32 = vpop.f32.mrf.mxu2 }
 0x1ad   :  { %v1617_v42 = vadd.f32 %v1616_v32, %v1603_v38 }
 0x1b3   :  { %v1630_v35 = vpop.f32.mrf.mxu3 }
 0x1b4   :  { %v1618_v51 = vpop.f32.mrf.mxu2  ;;  %v1631_v55 = vadd.f32 %v1630_v35, %v1617_v42 }
 0x1b5   :  { %v1619_v44 = vadd.f32 %v1618_v51, %v1605_v41 }
 0x1b6   :  { %v1638_v43 = vmax.f32 %v1631_v55, 0.0 }
 0x1bb   :  { %v1632_v45 = vpop.f32.mrf.mxu3 }
 0x1bc   :  { %v1633_v46 = vadd.f32 %v1632_v45, %v1619_v44 }
 0x1be   :  { %v1642_v47 = vmax.f32 %v1633_v46, 0.0 }
 0x1c0   :  { %v1646_v48 = vpack.c.bf16 %v1642_v47, %v1638_v43 }
 0x1c2   :  { %1957 = vmatmul.bf16.vlgmr.msra.gmra.mxu3 %v1646_v48 }
 0x1ff   :  { %v1916_v49 = vpop.f32.mrf.mxu0 }
 0x200   :  { %v1917_v53 = vadd.f32 %v3128_v20, %v1916_v49 }
 0x207   :  { %v1918_v57 = vpop.f32.mrf.mxu0 }
 0x208   :  { %v1919_v61 = vadd.f32 %v3128_v20, %v1918_v57 }
 0x20f   :  { %v1930_v50 = vpop.f32.mrf.mxu1 }
 0x210   :  { %v1931_v54 = vadd.f32 %v1930_v50, %v1917_v53 }
 0x217   :  { %v1932_v60 = vpop.f32.mrf.mxu1 }
 0x218   :  { %v1933_v63 = vadd.f32 %v1932_v60, %v1919_v61 }
 0x225   :  { %v1944_v52 = vpop.f32.mrf.mxu2 }
 0x226   :  { %v1945_v56 = vadd.f32 %v1944_v52, %v1931_v54 }
 0x22d   :  { %v1946_v62 = vpop.f32.mrf.mxu2 }
 0x22e   :  { %v1947_v0 = vadd.f32 %v1946_v62, %v1933_v63 }
 0x245   :  { %v1958_v58 = vpop.f32.mrf.mxu3 }
 0x246   :  { %v1959_v59 = vadd.f32 %v1958_v58, %v1945_v56 }
 0x248   :  { %1963 = vst [vmem:[#allocation11] sm:$0xff] %v1959_v59 }
 0x24d   :  { %v1960_v1 = vpop.f32.mrf.mxu3 }
 0x24e   :  { %v1961_v2 = vadd.f32 %v1960_v1, %v1947_v0 }
 0x250   :  { %1964 = vst [vmem:[#allocation11 + $0x8] sm:$0xff] %v1961_v2 }
 0x251   :  { %1977 = dma.vmem_to_hbm [thread:$0]  %s1970_s8, 256, %s1972_s11, [#allocation4], %s3288_s21, %s3288_s21, %s3289_s22  }
 0x252   :  { %3279 = dma.done.wait [#allocation4], 256  }
 0x253   :  { %3280 = vsyncadd [#allocation4], 4294967040 }
 0x254   :  { %1982 = vsyncpa [#allocation3], 1 }
 0x255   :  { %1983 = vsyncpa [#allocation6], 1 }
 0x256   :  { %1984 = vsyncpa [#allocation9], 1 }
 0x257   :  { %1985 = vsyncpa [#allocation4], 1 }

</bundles_post_ra>
